<compile_context>
chip_gen: v7x
topology: tpu7x:2x2x1
jax: 0.10.0
libtpu: 0.0.40
codegen_flags: <defaults>
</compile_context>

<pallas_src>
import math

import jax
import jax.numpy as jnp
from jax.experimental import pallas as pl
from jax.experimental.pallas import tpu as pltpu

# MXU operand dtype (peak-rate dtype on v5e/v6e/v7x); accumulation stays f32.
_MXU_DTYPE = jnp.bfloat16


def base_layer_kernel(x_ref, w1_ref, b1_ref, w2_ref, b2_ref, out_ref):
    gb, n, feat = x_ref.shape            # block is [Gb, N, F]
    emb = w1_ref.shape[1]
    emb_out = w2_ref.shape[1]

    # ---- projection: Linear(feat, emb) over the fused Gb*N rows -------------
    x_flat = x_ref[...].reshape(gb * n, feat).astype(_MXU_DTYPE)        # [Gb*N, F]
    b1 = b1_ref[...].astype(jnp.float32)                                # [1, E]
    xp_flat = jnp.dot(x_flat, w1_ref[...],
                      preferred_element_type=jnp.float32) + b1          # [Gb*N, E] f32
    xp_mm = xp_flat.astype(_MXU_DTYPE).reshape(gb, n, emb)              # [Gb, N, E] bf16

    # ---- adjacency: A_ = xp @ xp^T (batched; transpose absorbed by MXU) -----
    A_ = jnp.einsum('gne,gme->gnm', xp_mm, xp_mm,
                    preferred_element_type=jnp.float32)                 # [Gb, N, N] f32

    # ---- diag normalization: A = 2*A_[i,j] / (d_i + d_j) --------------------
    # hd = 0.5*d is computed from the same bf16 xp that fed the MXU so the
    # diagonal normalizes to ~1 self-consistently.  The N^2 elementwise chain
    # stays f32 (no bf16 VPU/EUP on v5e); the divide is one approx EUP vrcp.
    # NOTE: like the PyTorch reference, no epsilon guard for d_i + d_j == 0.
    xp_f32 = xp_mm.astype(jnp.float32)
    hd = 0.5 * jnp.sum(xp_f32 * xp_f32, axis=-1, keepdims=True)         # [Gb, N, 1]
    denom = hd + jnp.swapaxes(hd, -1, -2)                               # [Gb, N, N]
    A_mm = (A_ * pl.reciprocal(denom, approx=True)).astype(_MXU_DTYPE)  # [Gb, N, N]

    # ---- graph-weighted features + Linear(emb, emb_out) + ReLU --------------
    b2 = b2_ref[...].astype(jnp.float32)                                # [1, O]
    if emb_out < emb:
        # Reassociate (A @ xp) @ W2 == A @ (xp @ W2): saves 2*N^2*(E-O) FLOPs.
        pw = jnp.dot(xp_mm.reshape(gb * n, emb), w2_ref[...],
                     preferred_element_type=jnp.float32)                # [Gb*N, O]
        pw_mm = pw.astype(_MXU_DTYPE).reshape(gb, n, emb_out)
        feats = jnp.einsum('gnm,gmo->gno', A_mm, pw_mm,
                           preferred_element_type=jnp.float32) + b2     # [Gb, N, O]
    else:
        gwf = jnp.einsum('gnm,gme->gne', A_mm, xp_mm,
                         preferred_element_type=jnp.float32)            # [Gb, N, E]
        gwf_mm = gwf.astype(_MXU_DTYPE).reshape(gb * n, emb)
        feats = (jnp.dot(gwf_mm, w2_ref[...],
                         preferred_element_type=jnp.float32) + b2
                 ).reshape(gb, n, emb_out)                              # [Gb, N, O]

    out_ref[...] = jnp.maximum(feats, 0.0).astype(out_ref.dtype)


def _choose_graphs_per_step(g, n, target_rows=256):
    """Pick graphs/step: fused M >= ~256 rows (v6e MXU), >= 2 grid steps (v7x)."""
    divisors = [d for d in range(1, g + 1) if g % d == 0]
    # keep at least 2 grid steps so the "parallel" axis shards across 2 TCs
    candidates = [d for d in divisors if g // d >= 2] or divisors
    for d in candidates:
        if d * n >= target_rows:
            return d
    return candidates[-1]


def _vmem_budget_bytes(gb, n, feat, emb, emb_out):
    f32, bf16 = 4, 2
    rows = gb * n
    per_step = (
        2 * rows * feat * f32                       # x block (double-buffered)
        + 2 * rows * emb_out * f32                  # out block (double-buffered)
        + feat * emb * bf16 + emb * f32             # resident W1/b1 (single copy)
        + emb * emb_out * bf16 + emb_out * f32      # resident W2/b2 (single copy)
        + rows * emb * (f32 + bf16)                 # xp (f32) + bf16 copy
        + gb * n * n * (3 * f32 + bf16)             # A_, denom, A (+ bf16 copy)
        + rows * max(emb, emb_out) * f32            # gwf / pw
        + rows * emb_out * f32                      # feats
    )
    budget = 2 * per_step                           # headroom for compiler temps
    try:
        cap = int(0.75 * pltpu.get_tpu_info().vmem_capacity_bytes)
    except Exception:
        cap = 48 << 20                              # safe on all generations
    return int(min(max(budget, 4 << 20), cap))


def base_layer(x, w1, b1, w2, b2, *, out_dtype=jnp.float32):
    """x: [G, N, feat]; returns [G, N, emb_out].  Gb graphs per grid step.

    Pass out_dtype=jnp.bfloat16 to halve output HBM writeback if downstream
    accepts it (demo keeps f32 for the correctness check).
    """
    g, n, feat = x.shape
    emb = w1.shape[1]
    emb_out = w2.shape[1]
    gb = _choose_graphs_per_step(g, n)

    # MXU operands in bf16 (cast once, outside the kernel); biases stay f32.
    w1 = w1.astype(_MXU_DTYPE)
    w2 = w2.astype(_MXU_DTYPE)
    b1 = b1.astype(jnp.float32).reshape(1, emb)
    b2 = b2.astype(jnp.float32).reshape(1, emb_out)

    grid_spec = pltpu.PrefetchScalarGridSpec(
        num_scalar_prefetch=0,
        grid=(g // gb,),
        in_specs=[
            pl.BlockSpec((gb, n, feat), lambda i: (i, 0, 0)),
            # weights/biases: constant index_map -> stay VMEM-resident
            pl.BlockSpec((feat, emb), lambda i: (0, 0)),
            pl.BlockSpec((1, emb), lambda i: (0, 0)),
            pl.BlockSpec((emb, emb_out), lambda i: (0, 0)),
            pl.BlockSpec((1, emb_out), lambda i: (0, 0)),
        ],
        out_specs=pl.BlockSpec((gb, n, emb_out), lambda i: (i, 0, 0)),
    )

    return pl.pallas_call(
        base_layer_kernel,
        out_shape=jax.ShapeDtypeStruct((g, n, emb_out), out_dtype),
        grid_spec=grid_spec,
        compiler_params=pltpu.CompilerParams(
            # independent graph blocks -> shard across v7x's 2 TensorCores
            dimension_semantics=("parallel",),
            vmem_limit_bytes=_vmem_budget_bytes(gb, n, feat, emb, emb_out),
        ),
    )(x, w1, b1, w2, b2)


def _reference_single(x, w1, b1, w2, b2):
    xp = x @ w1 + b1
    A_ = xp @ xp.T
    d = jnp.diag(A_)[None, :]
    Dx = jnp.tile(d, (d.shape[1], 1))
    Dy = Dx.T
    A = 2.0 * A_ / (Dx + Dy)
    gwf = A @ xp
    return jax.nn.relu(gwf @ w2 + b2)


if __name__ == "__main__":
    # G independent graphs of N nodes each; N and hidden sizes are lane-dense.
    G, N, FEAT, EMB, EMB_OUT = 8, 128, 64, 128, 128

    key = jax.random.PRNGKey(0)
    kx, kw1, kb1, kw2, kb2 = jax.random.split(key, 5)

    x = jax.random.normal(kx, (G, N, FEAT), dtype=jnp.float32)

    # Deterministic PyTorch-style Linear init: U(-1/sqrt(fan_in), 1/sqrt(fan_in))
    bnd1 = 1.0 / math.sqrt(FEAT)
    w1 = jax.random.uniform(kw1, (FEAT, EMB), jnp.float32, -bnd1, bnd1)
    b1 = jax.random.uniform(kb1, (1, EMB), jnp.float32, -bnd1, bnd1)

    bnd2 = 1.0 / math.sqrt(EMB)
    w2 = jax.random.uniform(kw2, (EMB, EMB_OUT), jnp.float32, -bnd2, bnd2)
    b2 = jax.random.uniform(kb2, (1, EMB_OUT), jnp.float32, -bnd2, bnd2)

    out = base_layer(x, w1, b1, w2, b2)
    out = jax.block_until_ready(out)

    ref = jax.vmap(lambda xi: _reference_single(xi, w1, b1, w2, b2))(x)
    assert out.shape == (G, N, EMB_OUT)
    # Tolerance accounts for bf16 MXU operands (f32 accumulation) and the
    # approx EUP reciprocal in the adjacency normalization.
    assert jnp.allclose(out, ref, atol=3e-2, rtol=3e-2), "mismatch vs reference"

    print("KERNEL_OK")
</pallas_src>

<mosaic_0001>
module attributes {stable_mosaic.version = 11 : i64} {
  func.func @base_layer_kernel(%arg0: i32, %arg1: memref<2x128x64xf32, #tpu.memory_space<vmem>>, %arg2: memref<64x128xbf16, #tpu.memory_space<vmem>>, %arg3: memref<1x128xf32, #tpu.memory_space<vmem>>, %arg4: memref<128x128xbf16, #tpu.memory_space<vmem>>, %arg5: memref<1x128xf32, #tpu.memory_space<vmem>>, %arg6: memref<2x128x128xf32, #tpu.memory_space<vmem>>) attributes {dimension_semantics = [#tpu.dimension_semantics<parallel>], iteration_bounds = array<i64: 4>, scalar_prefetch = 0 : i64, scratch_operands = 0 : i64, tpu.core_type = #tpu.core_type<tc>, window_params = [{transform_indices = @transform_0, window_bounds = array<i64: 2, 128, 64>}, {pipeline_mode = #tpu.pipeline_mode<synchronous>, transform_indices = @transform_1, window_bounds = array<i64: 64, 128>}, {pipeline_mode = #tpu.pipeline_mode<synchronous>, transform_indices = @transform_2, window_bounds = array<i64: 1, 128>}, {pipeline_mode = #tpu.pipeline_mode<synchronous>, transform_indices = @transform_3, window_bounds = array<i64: 128, 128>}, {pipeline_mode = #tpu.pipeline_mode<synchronous>, transform_indices = @transform_4, window_bounds = array<i64: 1, 128>}, {transform_indices = @transform_5, window_bounds = array<i64: 2, 128, 128>}]} {
    %c0 = arith.constant 0 : index
    %c0_0 = arith.constant 0 : index
    %c0_1 = arith.constant 0 : index
    %0 = vector.load %arg1[%c0, %c0_0, %c0_1] : memref<2x128x64xf32, #tpu.memory_space<vmem>>, vector<2x128x64xf32>
    %1 = vector.shape_cast %0 : vector<2x128x64xf32> to vector<256x64xf32>
    %2 = arith.truncf %1 : vector<256x64xf32> to vector<256x64xbf16>
    %c0_2 = arith.constant 0 : index
    %c0_3 = arith.constant 0 : index
    %3 = vector.load %arg3[%c0_2, %c0_3] : memref<1x128xf32, #tpu.memory_space<vmem>>, vector<1x128xf32>
    %c0_4 = arith.constant 0 : index
    %c0_5 = arith.constant 0 : index
    %4 = vector.load %arg2[%c0_4, %c0_5] : memref<64x128xbf16, #tpu.memory_space<vmem>>, vector<64x128xbf16>
    %cst = arith.constant dense<0.000000e+00> : vector<256x128xf32>
    %5 = tpu.matmul %2, %4, %cst {dimension_numbers = #tpu.dot_dimension_numbers<[1], [0], [0], [1], [0, 0, 1, 1], [], []>} : vector<256x64xbf16>, vector<64x128xbf16>, vector<256x128xf32> -> vector<256x128xf32>
    %6 = vector.broadcast %3 : vector<1x128xf32> to vector<256x128xf32>
    %7 = arith.addf %5, %6 : vector<256x128xf32>
    %8 = arith.truncf %7 : vector<256x128xf32> to vector<256x128xbf16>
    %9 = vector.shape_cast %8 : vector<256x128xbf16> to vector<2x128x128xbf16>
    "tpu.trace_start"() <{level = 10 : i32, message = "gne,gme->gnm"}> : () -> ()
    %cst_6 = arith.constant dense<0.000000e+00> : vector<2x128x128xf32>
    %10 = tpu.matmul %9, %9, %cst_6 {dimension_numbers = #tpu.dot_dimension_numbers<[2], [2], [1], [1], [0, 0, 0, 1, 1, 1], [0], [0]>} : vector<2x128x128xbf16>, vector<2x128x128xbf16>, vector<2x128x128xf32> -> vector<2x128x128xf32>
    "tpu.trace_stop"() : () -> ()
    %11 = arith.extf %9 : vector<2x128x128xbf16> to vector<2x128x128xf32>
    %12 = arith.mulf %11, %11 : vector<2x128x128xf32>
    %cst_7 = arith.constant dense<0.000000e+00> : vector<2x128xf32>
    %13 = vector.multi_reduction <add>, %12, %cst_7 [2] : vector<2x128x128xf32> to vector<2x128xf32>
    %14 = vector.shape_cast %13 : vector<2x128xf32> to vector<2x128x1xf32>
    %cst_8 = arith.constant 5.000000e-01 : f32
    %15 = vector.broadcast %cst_8 : f32 to vector<2x128x1xf32>
    %16 = arith.mulf %15, %14 : vector<2x128x1xf32>
    %17 = tpu.transpose %16, [0, 2, 1] : vector<2x128x1xf32> -> vector<2x1x128xf32>
    %18 = vector.broadcast %16 : vector<2x128x1xf32> to vector<2x128x128xf32>
    %19 = vector.broadcast %17 : vector<2x1x128xf32> to vector<2x128x128xf32>
    %20 = arith.addf %18, %19 : vector<2x128x128xf32>
    %21 = tpu.reciprocal %20 {approx = true} : vector<2x128x128xf32> -> vector<2x128x128xf32>
    %22 = arith.mulf %10, %21 : vector<2x128x128xf32>
    %23 = arith.truncf %22 : vector<2x128x128xf32> to vector<2x128x128xbf16>
    %c0_9 = arith.constant 0 : index
    %c0_10 = arith.constant 0 : index
    %24 = vector.load %arg5[%c0_9, %c0_10] : memref<1x128xf32, #tpu.memory_space<vmem>>, vector<1x128xf32>
    "tpu.trace_start"() <{level = 10 : i32, message = "gnm,gme->gne"}> : () -> ()
    %cst_11 = arith.constant dense<0.000000e+00> : vector<2x128x128xf32>
    %25 = tpu.matmul %23, %9, %cst_11 {dimension_numbers = #tpu.dot_dimension_numbers<[2], [1], [1], [2], [0, 0, 0, 1, 1, 2], [0], [0]>} : vector<2x128x128xbf16>, vector<2x128x128xbf16>, vector<2x128x128xf32> -> vector<2x128x128xf32>
    "tpu.trace_stop"() : () -> ()
    %26 = arith.truncf %25 : vector<2x128x128xf32> to vector<2x128x128xbf16>
    %27 = vector.shape_cast %26 : vector<2x128x128xbf16> to vector<256x128xbf16>
    %c0_12 = arith.constant 0 : index
    %c0_13 = arith.constant 0 : index
    %28 = vector.load %arg4[%c0_12, %c0_13] : memref<128x128xbf16, #tpu.memory_space<vmem>>, vector<128x128xbf16>
    %cst_14 = arith.constant dense<0.000000e+00> : vector<256x128xf32>
    %29 = tpu.matmul %27, %28, %cst_14 {dimension_numbers = #tpu.dot_dimension_numbers<[1], [0], [0], [1], [0, 0, 1, 1], [], []>} : vector<256x128xbf16>, vector<128x128xbf16>, vector<256x128xf32> -> vector<256x128xf32>
    %30 = vector.broadcast %24 : vector<1x128xf32> to vector<256x128xf32>
    %31 = arith.addf %29, %30 : vector<256x128xf32>
    %32 = vector.shape_cast %31 : vector<256x128xf32> to vector<2x128x128xf32>
    %cst_15 = arith.constant 0.000000e+00 : f32
    %33 = vector.broadcast %cst_15 : f32 to vector<2x128x128xf32>
    %34 = arith.maximumf %32, %33 : vector<2x128x128xf32>
    %c0_16 = arith.constant 0 : index
    %c0_17 = arith.constant 0 : index
    %c0_18 = arith.constant 0 : index
    %35 = vector.load %arg6[%c0_16, %c0_17, %c0_18] : memref<2x128x128xf32, #tpu.memory_space<vmem>>, vector<2x128x128xf32>
    tpu.vector_store %arg6[%c0_16, %c0_17, %c0_18], %34 {strides = array<i32>} : memref<2x128x128xf32, #tpu.memory_space<vmem>>, vector<2x128x128xf32>,
    return
  }
  func.func @transform_0(%arg0: i32) -> (i32, i32, i32) {
    %c0_i32 = arith.constant 0 : i32
    %c0_i32_0 = arith.constant 0 : i32
    %c0_i32_1 = arith.constant 0 : i32
    return %arg0, %c0_i32, %c0_i32_0 : i32, i32, i32
  }
  func.func @transform_1(%arg0: i32) -> (i32, i32) {
    %c0_i32 = arith.constant 0 : i32
    %c0_i32_0 = arith.constant 0 : i32
    %c0_i32_1 = arith.constant 0 : i32
    return %c0_i32, %c0_i32_0 : i32, i32
  }
  func.func @transform_2(%arg0: i32) -> (i32, i32) {
    %c0_i32 = arith.constant 0 : i32
    %c0_i32_0 = arith.constant 0 : i32
    %c0_i32_1 = arith.constant 0 : i32
    return %c0_i32, %c0_i32_0 : i32, i32
  }
  func.func @transform_3(%arg0: i32) -> (i32, i32) {
    %c0_i32 = arith.constant 0 : i32
    %c0_i32_0 = arith.constant 0 : i32
    %c0_i32_1 = arith.constant 0 : i32
    return %c0_i32, %c0_i32_0 : i32, i32
  }
  func.func @transform_4(%arg0: i32) -> (i32, i32) {
    %c0_i32 = arith.constant 0 : i32
    %c0_i32_0 = arith.constant 0 : i32
    %c0_i32_1 = arith.constant 0 : i32
    return %c0_i32, %c0_i32_0 : i32, i32
  }
  func.func @transform_5(%arg0: i32) -> (i32, i32, i32) {
    %c0_i32 = arith.constant 0 : i32
    %c0_i32_0 = arith.constant 0 : i32
    %c0_i32_1 = arith.constant 0 : i32
    return %arg0, %c0_i32, %c0_i32_0 : i32, i32, i32
  }
}

</mosaic_0001>

<bundles_post_ra>
// kernel: tpu_custom_call.1
= control target key start
LH: loop header
LB: loop body
LE: loop exit
PB: predicated region body
PF: predicated region fallthrough
CT: control target
= control target key end

     0   :  { %10 = vsyncpa [#allocation3], 0  ;;  %s2899_s0 = inlined_call_operand.vmem [shape: f32[8,128,64], index: 0, kind: input, shape index: {}]   ;;  %s2900_s1 = inlined_call_operand.vmem [shape: bf16[64,128], index: 1, kind: input, shape index: {}]   ;;  %s2901_s2 = inlined_call_operand.vmem [shape: f32[1,128], index: 2, kind: input, shape index: {}]   ;;  %s2902_s3 = inlined_call_operand.vmem [shape: bf16[128,128], index: 3, kind: input, shape index: {}]   ;;  %s2903_s4 = inlined_call_operand.vmem [shape: f32[1,128], index: 4, kind: input, shape index: {}]   ;;  %s2904_s5 = inlined_call_operand.hbm [shape: f32[8,128,128], index: 5, kind: output, shape index: {}]  }
   0x1   :  { %12 = vsyncpa [#allocation3 + $0x1], 0  ;;  %s2265_s18 = smov 0   ;;  %s2267_s19 = smov 0  }
   0x2   :  { %s2269_s20 = smov 0   ;;  %s2271_s21 = smov 0  }
   0x3 LB: > { %s2286_s22 = sadd.s32 4294967295, %s2230_s21   ;;  %s1664_s23 = sadd.s32 4294967294, %s2230_s21   ;;  %s2230_s21 = sphi %s2271_s21, %s2910_s21   ;;  %s2226_s20 = sphi %s2269_s20, %s2909_s20   ;;  %s2222_s19 = sphi %s2267_s19, %s2908_s19   ;;  %s2218_s18 = sphi %s2265_s18, %s2907_s18  }
   0x4   : > { %s2290_s24 = sadd.s32 1, %s2230_s21   ;;  %s135_s25 = sadd.s32 1, %s2226_s20 }
   0x5   : > { %s132_s26 = ssub.s32 %s2230_s21, %s2290_s24  ;;  %p145_p0 = scmp.ne.s32.totalorder %s2226_s20, %s2222_s19 }
   0x6   : > { %p133_p1 = scmp.eq.s32.totalorder %s132_s26, 0  ;;  %p146_p2 = scmp.eq.s32.totalorder %s2286_s22, 3 }
   0x7   : > { %p151_p3 = scmp.ne.s32.totalorder %s2222_s19, %s2218_s18  ;;  %p152_p4 = scmp.eq.s32.totalorder %s1664_s23, 3 }
   0x8   : > { %s2301_s27 = scalar_select %p133_p1, %s2226_s20, %s135_s25  }
   0x9   : > { %p2303_p5 = por %p146_p2, %p145_p0  ;;  %p2307_p6 = por %p152_p4, %p151_p3 }
   0xa   : > { %p1667_p7 = scmp.ge.s32.totalorder %s2230_s21, 1  ;;  %p192_p8 = scmp.lt.s32.totalorder %s2230_s21, 5 }
   0xc   : > { %p193_p9 = pnand %p1667_p7, %p192_p8 }
   0xd   : > { %v2092_v0 = vld [vmem:[%s2900_s1] sm:$0xff] (!%p193_p9)   ;;  %s1669_s7 = sshll.u32 (!%p193_p9), %s2286_s22, 1  ;;  %v2093_v1 = vld [vmem:[%s2900_s1 + $0x8] sm:$0xff] (!%p193_p9)   ;;  %v2094_v2 = vld [vmem:[%s2900_s1 + $0x10] sm:$0xff] (!%p193_p9)   ;;  %vm317_vm0 = vcmask (!%p193_p9), 523264   ;;  %s218_s26 = sand.u32 (!%p193_p9), 1, %s2222_s19  }
   0xe   : > { %196 = sbr.rel (%p193_p9) target bundleno = 1072 (0x430), region = 40  ;;  %p222_p10 = scmp.lt.s32.totalorder (!%p193_p9), %s1669_s7, 7  ;;  %1819 = vmatprep.subr.bf16.mxu0 (!%p193_p9), %v2092_v0  ;;  %v2095_v5 = vld [vmem:[%s2900_s1 + $0x18] sm:$0xff] (!%p193_p9)   ;;  %v2382_v53 = vld [vmem:[%s2901_s2] ss:$0 sm:$0xff] (!%p193_p9) }
   0xf   : > { %1820 = vmatpush3.bf16.msra.mxu0 (!%p193_p9), %v2092_v0  ;;  %s1710_s9 = sshll.u32 (!%p193_p9), %s2286_s22, 12  ;;  %s2858_s22 = scalar_lea.sflag (!%p193_p9), [#allocation3], %s218_s26 }
  0x10   : > { %1821 = vmatprep.subr.bf16.mxu0 (!%p193_p9), %v2093_v1  ;;  %s2849_s13 = scalar_lea.hbm (!%p193_p9), %s2904_s5, %s1710_s9 }
  0x13   : > { %1822 = vmatpush3.bf16.msra.mxu0 (!%p193_p9), %v2093_v1 }
  0x14   : > { %1823 = vmatprep.subr.bf16.mxu0 (!%p193_p9), %v2094_v2 }
  0x15   : > { %s2912_s7 = smov (!%p222_p10, %s1669_s7), 7 }
  0x16   : > { %s1708_s12 = sshll.u32 %s2912_s7, 7  ;;  %s1668_s7 = sshll.u32 %s218_s26, 8 }
  0x17   : > { %s2326_s15 = scalar_lea.vmem %s2899_s0, %s1708_s12  ;;  %1824 = vmatpush3.bf16.msra.mxu0 %v2094_v2  ;;  %s2785_s8 = scalar_lea.vmem [#allocation2], %s1668_s7 }
  0x18   : > { %v230_v3 = vld [vmem:[%s2326_s15] sm:$0xff]  ;;  %v231_v4 = vld [vmem:[%s2326_s15 + $0x8] sm:$0xff]  ;;  %v232_v7 = vld [vmem:[%s2326_s15 + $0x10] sm:$0xff]  ;;  %1825 = vmatprep.subr.bf16.mxu0 %v2095_v5  ;;  %s1602_s10 = sshll.u32 %s2785_s8, 4  ;;  %s2851_s10 = int_to_ptr.vmem [resolvable:$true] %s1602_s10 }
  0x19   : > { %v262_v6 = vpack.c.bf16 %v231_v4, %v230_v3  ;;  %v233_v8 = vld [vmem:[%s2326_s15 + $0x18] sm:$0xff]  ;;  %v234_v9 = vld [vmem:[%s2326_s15 + $0x20] sm:$0xff]  ;;  %v235_v10 = vld [vmem:[%s2326_s15 + $0x28] sm:$0xff]  ;;  %s2168_s14 = scalar_lea.vmem %s2851_s10, 4096 }
  0x1a   : > { %v263_v11 = vpack.c.bf16 %v233_v8, %v232_v7  ;;  %v264_v12 = vpack.c.bf16 %v235_v10, %v234_v9  ;;  %v236_v13 = vld [vmem:[%s2326_s15 + $0x30] sm:$0xff]  ;;  %v237_v14 = vld [vmem:[%s2326_s15 + $0x38] sm:$0xff]  ;;  %v238_v15 = vld [vmem:[%s2326_s15 + $0x40] sm:$0xff]  ;;  %p2169_p11 = scmp.ne.s32.totalorder %s2851_s10, %s2168_s14 }
  0x1b   : > { %1827 = vmatprep.mubr.msk.bf16.mxu0 %vm317_vm0, %v262_v6  ;;  %1826 = vmatpush3.bf16.msra.mxu0 %v2095_v5  ;;  %v239_v16 = vld [vmem:[%s2326_s15 + $0x48] sm:$0xff]  ;;  %v265_v17 = vpack.c.bf16 %v237_v14, %v236_v13  ;;  %v240_v19 = vld [vmem:[%s2326_s15 + $0x50] sm:$0xff]  ;;  %v241_v20 = vld [vmem:[%s2326_s15 + $0x58] sm:$0xff] }
  0x1c   : > { %v266_v18 = vpack.c.bf16 %v239_v16, %v238_v15  ;;  %v242_v21 = vld [vmem:[%s2326_s15 + $0x60] sm:$0xff]  ;;  %v243_v22 = vld [vmem:[%s2326_s15 + $0x68] sm:$0xff]  ;;  %v267_v23 = vpack.c.bf16 %v241_v20, %v240_v19  ;;  %v244_v25 = vld [vmem:[%s2326_s15 + $0x70] sm:$0xff]  ;;  %p2170_p12 = pnand %p2169_p11, %p2303_p5 }
  0x1d   : > { %v268_v24 = vpack.c.bf16 %v243_v22, %v242_v21  ;;  %v245_v26 = vld [vmem:[%s2326_s15 + $0x78] sm:$0xff]  ;;  %v246_v27 = vld [vmem:[%s2326_s15 + $0x80] sm:$0xff]  ;;  %v247_v28 = vld [vmem:[%s2326_s15 + $0x88] sm:$0xff] }
  0x1e   : > { %1828 = vmatmul.mubr.msk.bf16.vlgmr.msra.gmra.mrb[0].mxu0 %vm317_vm0, %v263_v11  ;;  %v269_v29 = vpack.c.bf16 %v245_v26, %v244_v25  ;;  %v270_v30 = vpack.c.bf16 %v247_v28, %v246_v27  ;;  %v248_v31 = vld [vmem:[%s2326_s15 + $0x90] sm:$0xff]  ;;  %v249_v32 = vld [vmem:[%s2326_s15 + $0x98] sm:$0xff]  ;;  %v250_v33 = vld [vmem:[%s2326_s15 + $0xa0] sm:$0xff]  ;;  %p2171_p13 = pneg %p2170_p12 }
  0x1f   : > { %1831 = vmatprep.mubr.msk.bf16.mxu0 %vm317_vm0, %v264_v12  ;;  %v251_v34 = vld [vmem:[%s2326_s15 + $0xa8] sm:$0xff]  ;;  %v271_v35 = vpack.c.bf16 %v249_v32, %v248_v31  ;;  %v252_v37 = vld [vmem:[%s2326_s15 + $0xb0] sm:$0xff]  ;;  %v253_v38 = vld [vmem:[%s2326_s15 + $0xb8] sm:$0xff] }
  0x20   : > { %v272_v36 = vpack.c.bf16 %v251_v34, %v250_v33  ;;  %v254_v39 = vld [vmem:[%s2326_s15 + $0xc0] sm:$0xff]  ;;  %v255_v40 = vld [vmem:[%s2326_s15 + $0xc8] sm:$0xff]  ;;  %v273_v41 = vpack.c.bf16 %v253_v38, %v252_v37  ;;  %v256_v43 = vld [vmem:[%s2326_s15 + $0xd0] sm:$0xff] }
  0x21   : > { %v274_v42 = vpack.c.bf16 %v255_v40, %v254_v39  ;;  %v257_v44 = vld [vmem:[%s2326_s15 + $0xd8] sm:$0xff]  ;;  %v258_v45 = vld [vmem:[%s2326_s15 + $0xe0] sm:$0xff]  ;;  %v259_v46 = vld [vmem:[%s2326_s15 + $0xe8] sm:$0xff] }
  0x22   : > { %v275_v47 = vpack.c.bf16 %v257_v44, %v256_v43  ;;  %v276_v48 = vpack.c.bf16 %v259_v46, %v258_v45  ;;  %v260_v49 = vld [vmem:[%s2326_s15 + $0xf0] sm:$0xff]  ;;  %v261_v50 = vld [vmem:[%s2326_s15 + $0xf8] sm:$0xff]  ;;  %s2232_s15 = smov [#allocation2]  }
  0x23   : > { %v277_v51 = vpack.c.bf16 %v261_v50, %v260_v49  ;;  %s2172_s16 = sshll.u32 %s2232_s15, 4  ;;  %s2173_s16 = int_to_ptr.vmem [resolvable:$false] %s2172_s16 }
  0x24   : > { %s2174_s17 = scalar_lea.vmem %s2173_s16, 8192  ;;  %p2175_p0 = scmp.lt.s32.totalorder %s2851_s10, %s2173_s16 }
  0x25   : > { %p2176_p1 = scmp.lt.s32.totalorder %s2174_s17, %s2168_s14 }
  0x26   : > { %1832 = vmatmul.mubr.msk.bf16.gmra.mrb[4].mxu0 %vm317_vm0, %v265_v17 }
  0x27   : > { %1835 = vmatprep.mubr.msk.bf16.mxu0 %vm317_vm0, %v266_v18  ;;  %p2177_p2 = por %p2176_p1, %p2175_p0 }
  0x29   : > { %p2178_p3 = pnand %p2177_p2, %p2171_p13 }
  0x2e   : > { %1836 = vmatmul.mubr.msk.bf16.gmra.mrb[8].mxu0 %vm317_vm0, %v267_v23 }
  0x2f   : > { %1839 = vmatprep.mubr.msk.bf16.mxu0 %vm317_vm0, %v268_v24 }
  0x36   : > { %1840 = vmatmul.mubr.msk.bf16.gmra.mrb[12].mxu0 %vm317_vm0, %v269_v29 }
  0x37   : > { %1843 = vmatprep.mubr.msk.bf16.mxu0 %vm317_vm0, %v270_v30 }
  0x3e   : > { %1844 = vmatmul.mubr.msk.bf16.gmra.mrb[16].mxu0 %vm317_vm0, %v271_v35 }
  0x3f   : > { %1847 = vmatprep.mubr.msk.bf16.mxu0 %vm317_vm0, %v272_v36 }
  0x46   : > { %1848 = vmatmul.mubr.msk.bf16.gmra.mrb[20].mxu0 %vm317_vm0, %v273_v41 }
  0x47   : > { %1851 = vmatprep.mubr.msk.bf16.mxu0 %vm317_vm0, %v274_v42 }
  0x4e   : > { %1852 = vmatmul.mubr.msk.bf16.gmra.mrb[24].mxu0 %vm317_vm0, %v275_v47 }
  0x4f   : > { %1855 = vmatprep.mubr.msk.bf16.mxu0 %vm317_vm0, %v276_v48 }
  0x56   : > { %1856 = vmatmul.mubr.msk.bf16.gmra.mrb[28].mxu0 %vm317_vm0, %v277_v51 }
  0xf1   : > { %v1829_v52 = vpop.f32.mrb[0].mxu0 }
  0xf2   : > { %v400_v54 = vpop.f32.mrb[1].mxu0  ;;  %v409_v56 = vadd.f32 %v1829_v52, %v2382_v53 }
  0xf3   : > { %v1830_v55 = vpop.f32.mrb[2].mxu0  ;;  %v401_v59 = vadd.f32 %v2382_v53, %v400_v54 }
  0xf4   : > { %v412_v57 = vadd.f32 %v1830_v55, %v2382_v53  ;;  %v403_v58 = vpop.f32.mrb[3].mxu0 }
  0xf5   : > { %v404_v60 = vadd.f32 %v2382_v53, %v403_v58 }
  0xf6   : > { %v2388_v61 = vpack.c.bf16 %v412_v57, %v409_v56 }
  0xf7   : > { %v2390_v62 = vpack.c.bf16 %v404_v60, %v401_v59 }
  0xf8   : > { %v739_v63 = vunpack.c.l.bf16 %v2388_v61  ;;  %v740_v5 = vunpack.c.h.bf16 %v2388_v61 }
  0xf9   : > { %v1833_v0 = vpop.f32.mrb[4].mxu0  ;;  %1859 = vmatprep.subr.bf16.mxu1 %v2390_v62  ;;  %1875 = vmatprep.mubr.bf16.mxu1 %v2390_v62  ;;  %v737_v1 = vunpack.c.l.bf16 %v2390_v62  ;;  %v738_v8 = vunpack.c.h.bf16 %v2390_v62 }
  0xfa   : > { %v425_v2 = vadd.f32 %v1833_v0, %v2382_v53  ;;  %v416_v3 = vpop.f32.mrb[5].mxu0  ;;  %1860 = vmatpush3.bf16.xpose.msra.mxu1 %v2390_v62  ;;  %v771_v4 = vmul.f32 %v739_v63, %v739_v63  ;;  %v772_v14 = vmul.f32 %v740_v5, %v740_v5 }
  0xfb   : > { %v1834_v6 = vpop.f32.mrb[6].mxu0  ;;  %1861 = vmatprep.subr.bf16.mxu1 %v2388_v61  ;;  %v769_v7 = vmul.f32 %v737_v1, %v737_v1  ;;  %v417_v11 = vadd.f32 %v2382_v53, %v416_v3  ;;  %v770_v16 = vmul.f32 %v738_v8, %v738_v8 }
  0xfc   : > { %v428_v9 = vadd.f32 %v1834_v6, %v2382_v53  ;;  %805 = vadd.xlane.f32.xlu1 %v771_v4  ;;  %v419_v10 = vpop.f32.mrb[7].mxu0 }
  0xfd   : > { %v420_v12 = vadd.f32 %v2382_v53, %v419_v10  ;;  %801 = vadd.xlane.f32.xlu0 %v769_v7 }
  0xfe   : > { %v2404_v13 = vpack.c.bf16 %v428_v9, %v425_v2 }
  0xff   : > { %v2406_v15 = vpack.c.bf16 %v420_v12, %v417_v11 }
 0x100   : > { %807 = vadd.xlane.f32.xlu1 %v772_v14  ;;  %v744_v17 = vunpack.c.h.bf16 %v2404_v13  ;;  %v743_v18 = vunpack.c.l.bf16 %v2404_v13 }
 0x101   : > { %v1837_v19 = vpop.f32.mrb[8].mxu0  ;;  %803 = vadd.xlane.f32.xlu0 %v770_v16  ;;  %v742_v24 = vunpack.c.h.bf16 %v2406_v15  ;;  %v741_v26 = vunpack.c.l.bf16 %v2406_v15 }
 0x102   : > { %v441_v20 = vadd.f32 %v1837_v19, %v2382_v53  ;;  %v432_v21 = vpop.f32.mrb[9].mxu0  ;;  %1862 = vmatpush3.bf16.xpose.msra.mxu1 %v2388_v61  ;;  %v776_v22 = vmul.f32 %v744_v17, %v744_v17  ;;  %v775_v23 = vmul.f32 %v743_v18, %v743_v18 }
 0x103   : > { %v1838_v25 = vpop.f32.mrb[10].mxu0  ;;  %1863 = vmatprep.subr.bf16.mxu1 %v2406_v15  ;;  %v433_v29 = vadd.f32 %v2382_v53, %v432_v21  ;;  %v774_v32 = vmul.f32 %v742_v24, %v742_v24  ;;  %v773_v34 = vmul.f32 %v741_v26, %v741_v26 }
 0x104   : > { %v444_v27 = vadd.f32 %v1838_v25, %v2382_v53  ;;  %815 = vadd.xlane.f32.xlu1 %v776_v22  ;;  %v435_v28 = vpop.f32.mrb[11].mxu0 }
 0x105   : > { %v436_v30 = vadd.f32 %v2382_v53, %v435_v28  ;;  %813 = vadd.xlane.f32.xlu0 %v775_v23 }
 0x106   : > { %v2418_v31 = vpack.c.bf16 %v444_v27, %v441_v20 }
 0x107   : > { %v2420_v33 = vpack.c.bf16 %v436_v30, %v433_v29 }
 0x108   : > { %811 = vadd.xlane.f32.xlu1 %v774_v32  ;;  %v748_v35 = vunpack.c.h.bf16 %v2418_v31  ;;  %v747_v36 = vunpack.c.l.bf16 %v2418_v31 }
 0x109   : > { %v1841_v37 = vpop.f32.mrb[12].mxu0  ;;  %809 = vadd.xlane.f32.xlu0 %v773_v34  ;;  %v746_v42 = vunpack.c.h.bf16 %v2420_v33  ;;  %v745_v44 = vunpack.c.l.bf16 %v2420_v33 }
 0x10a   : > { %v457_v38 = vadd.f32 %v1841_v37, %v2382_v53  ;;  %v448_v39 = vpop.f32.mrb[13].mxu0  ;;  %1864 = vmatpush3.bf16.xpose.msra.mxu1 %v2406_v15  ;;  %v780_v40 = vmul.f32 %v748_v35, %v748_v35  ;;  %v779_v41 = vmul.f32 %v747_v36, %v747_v36 }
 0x10b   : > { %v1842_v43 = vpop.f32.mrb[14].mxu0  ;;  %1865 = vmatprep.subr.bf16.mxu1 %v2404_v13  ;;  %v449_v47 = vadd.f32 %v2382_v53, %v448_v39  ;;  %v778_v50 = vmul.f32 %v746_v42, %v746_v42  ;;  %v777_v52 = vmul.f32 %v745_v44, %v745_v44 }
 0x10c   : > { %v460_v45 = vadd.f32 %v1842_v43, %v2382_v53  ;;  %v451_v46 = vpop.f32.mrb[15].mxu0  ;;  %823 = vadd.xlane.f32.xlu1 %v780_v40 }
 0x10d   : > { %v452_v48 = vadd.f32 %v2382_v53, %v451_v46  ;;  %821 = vadd.xlane.f32.xlu0 %v779_v41 }
 0x10e   : > { %v2432_v49 = vpack.c.bf16 %v460_v45, %v457_v38 }
 0x10f   : > { %v2434_v51 = vpack.c.bf16 %v452_v48, %v449_v47 }
 0x110   : > { %819 = vadd.xlane.f32.xlu1 %v778_v50  ;;  %v752_v54 = vunpack.c.h.bf16 %v2432_v49  ;;  %v751_v55 = vunpack.c.l.bf16 %v2432_v49 }
 0x111   : > { %v1845_v56 = vpop.f32.mrb[16].mxu0  ;;  %817 = vadd.xlane.f32.xlu0 %v777_v52  ;;  %v750_v63 = vunpack.c.h.bf16 %v2434_v51  ;;  %v749_v3 = vunpack.c.l.bf16 %v2434_v51 }
 0x112   : > { %v473_v57 = vadd.f32 %v1845_v56, %v2382_v53  ;;  %v464_v58 = vpop.f32.mrb[17].mxu0  ;;  %1866 = vmatpush3.bf16.xpose.msra.mxu1 %v2404_v13  ;;  %v784_v59 = vmul.f32 %v752_v54, %v752_v54  ;;  %v783_v60 = vmul.f32 %v751_v55, %v751_v55 }
 0x113   : > { %v1846_v0 = vpop.f32.mrb[18].mxu0  ;;  %1867 = vmatprep.subr.bf16.mxu1 %v2420_v33  ;;  %v465_v4 = vadd.f32 %v2382_v53, %v464_v58  ;;  %v782_v7 = vmul.f32 %v750_v63, %v750_v63  ;;  %v781_v9 = vmul.f32 %v749_v3, %v749_v3 }
 0x114   : > { %v476_v1 = vadd.f32 %v1846_v0, %v2382_v53  ;;  %v467_v2 = vpop.f32.mrb[19].mxu0  ;;  %831 = vadd.xlane.f32.xlu1 %v784_v59 }
 0x115   : > { %v468_v5 = vadd.f32 %v2382_v53, %v467_v2  ;;  %829 = vadd.xlane.f32.xlu0 %v783_v60 }
 0x116   : > { %v2446_v6 = vpack.c.bf16 %v476_v1, %v473_v57 }
 0x117   : > { %v2448_v8 = vpack.c.bf16 %v468_v5, %v465_v4 }
 0x118   : > { %827 = vadd.xlane.f32.xlu1 %v782_v7  ;;  %v756_v10 = vunpack.c.h.bf16 %v2446_v6  ;;  %v755_v11 = vunpack.c.l.bf16 %v2446_v6 }
 0x119   : > { %1891 = vmatprep.subr.bf16.mxu0 %v2448_v8  ;;  %1907 = vmatprep.mubr.bf16.mxu0 %v2448_v8  ;;  %v1849_v12 = vpop.f32.mrb[20].mxu0  ;;  %v754_v19 = vunpack.c.h.bf16 %v2448_v8  ;;  %v753_v23 = vunpack.c.l.bf16 %v2448_v8 }
 0x11a   : > { %825 = vadd.xlane.f32.xlu0 %v781_v9  ;;  %1868 = vmatpush3.bf16.xpose.msra.mxu1 %v2420_v33  ;;  %v489_v14 = vadd.f32 %v1849_v12, %v2382_v53  ;;  %v788_v16 = vmul.f32 %v756_v10, %v756_v10  ;;  %v480_v17 = vpop.f32.mrb[21].mxu0  ;;  %v787_v18 = vmul.f32 %v755_v11, %v755_v11 }
 0x11b   : > { %1892 = vmatpush3.bf16.xpose.msra.mxu0 %v2448_v8  ;;  %1869 = vmatprep.subr.bf16.mxu1 %v2418_v31  ;;  %v481_v20 = vadd.f32 %v2382_v53, %v480_v17  ;;  %v1850_v21 = vpop.f32.mrb[22].mxu0  ;;  %v786_v27 = vmul.f32 %v754_v19, %v754_v19  ;;  %v785_v29 = vmul.f32 %v753_v23, %v753_v23 }
 0x11c   : > { %1893 = vmatprep.subr.bf16.mxu0 %v2446_v6  ;;  %839 = vadd.xlane.f32.xlu1 %v788_v16  ;;  %v492_v22 = vadd.f32 %v1850_v21, %v2382_v53  ;;  %v483_v24 = vpop.f32.mrb[23].mxu0 }
 0x11d   : > { %v484_v25 = vadd.f32 %v2382_v53, %v483_v24 }
 0x11e   : > { %837 = vadd.xlane.f32.xlu0 %v787_v18  ;;  %v2464_v26 = vpack.c.bf16 %v492_v22, %v489_v14 }
 0x11f   : > { %v2466_v28 = vpack.c.bf16 %v484_v25, %v481_v20 }
 0x120   : > { %835 = vadd.xlane.f32.xlu1 %v786_v27  ;;  %v760_v30 = vunpack.c.h.bf16 %v2464_v26  ;;  %v759_v32 = vunpack.c.l.bf16 %v2464_v26 }
 0x121   : > { %v758_v34 = vunpack.c.h.bf16 %v2466_v28  ;;  %v1853_v35 = vpop.f32.mrb[24].mxu0  ;;  %v757_v38 = vunpack.c.l.bf16 %v2466_v28 }
 0x122   : > { %833 = vadd.xlane.f32.xlu0 %v785_v29  ;;  %1870 = vmatpush3.bf16.xpose.msra.mxu1 %v2418_v31  ;;  %v792_v36 = vmul.f32 %v760_v30, %v760_v30  ;;  %v791_v37 = vmul.f32 %v759_v32, %v759_v32  ;;  %v505_v39 = vadd.f32 %v1853_v35, %v2382_v53  ;;  %v496_v40 = vpop.f32.mrb[25].mxu0 }
 0x123   : > { %1894 = vmatpush3.bf16.xpose.msra.mxu0 %v2446_v6  ;;  %1871 = vmatprep.subr.bf16.mxu1 %v2434_v51  ;;  %v497_v41 = vadd.f32 %v2382_v53, %v496_v40  ;;  %v1854_v42 = vpop.f32.mrb[26].mxu0  ;;  %v790_v43 = vmul.f32 %v758_v34, %v758_v34  ;;  %v789_v47 = vmul.f32 %v757_v38, %v757_v38 }
 0x124   : > { %1895 = vmatprep.subr.bf16.mxu0 %v2466_v28  ;;  %847 = vadd.xlane.f32.xlu1 %v792_v36  ;;  %v508_v44 = vadd.f32 %v1854_v42, %v2382_v53  ;;  %v499_v45 = vpop.f32.mrb[27].mxu0 }
 0x125   : > { %v500_v46 = vadd.f32 %v2382_v53, %v499_v45 }
 0x126   : > { %845 = vadd.xlane.f32.xlu0 %v791_v37  ;;  %v2480_v48 = vpack.c.bf16 %v508_v44, %v505_v39 }
 0x127   : > { %v2482_v50 = vpack.c.bf16 %v500_v46, %v497_v41 }
 0x128   : > { %843 = vadd.xlane.f32.xlu1 %v790_v43  ;;  %v764_v52 = vunpack.c.h.bf16 %v2480_v48  ;;  %v763_v54 = vunpack.c.l.bf16 %v2480_v48 }
 0x129   : > { %v762_v55 = vunpack.c.h.bf16 %v2482_v50  ;;  %v1857_v56 = vpop.f32.mrb[28].mxu0  ;;  %v761_v59 = vunpack.c.l.bf16 %v2482_v50 }
 0x12a   : > { %1872 = vmatpush3.bf16.xpose.msra.mxu1 %v2434_v51  ;;  %841 = vadd.xlane.f32.xlu0 %v789_v47  ;;  %v796_v57 = vmul.f32 %v764_v52, %v764_v52  ;;  %v795_v58 = vmul.f32 %v763_v54, %v763_v54  ;;  %v521_v60 = vadd.f32 %v1857_v56, %v2382_v53  ;;  %v512_v63 = vpop.f32.mrb[29].mxu0 }
 0x12b   : > { %1896 = vmatpush3.bf16.xpose.msra.mxu0 %v2466_v28  ;;  %1873 = vmatprep.subr.bf16.mxu1 %v2432_v49  ;;  %v513_v0 = vadd.f32 %v2382_v53, %v512_v63  ;;  %v1858_v1 = vpop.f32.mrb[30].mxu0  ;;  %v794_v2 = vmul.f32 %v762_v55, %v762_v55  ;;  %v793_v7 = vmul.f32 %v761_v59, %v761_v59 }
 0x12c   : > { %1897 = vmatprep.subr.bf16.mxu0 %v2464_v26  ;;  %855 = vadd.xlane.f32.xlu1 %v796_v57  ;;  %v524_v3 = vadd.f32 %v1858_v1, %v2382_v53  ;;  %v515_v4 = vpop.f32.mrb[31].mxu0 }
 0x12d   : > { %v516_v5 = vadd.f32 %v2382_v53, %v515_v4 }
 0x12e   : > { %853 = vadd.xlane.f32.xlu0 %v795_v58  ;;  %v2496_v9 = vpack.c.bf16 %v524_v3, %v521_v60 }
 0x12f   : > { %v2498_v10 = vpack.c.bf16 %v516_v5, %v513_v0 }
 0x130   : > { %851 = vadd.xlane.f32.xlu1 %v794_v2  ;;  %v768_v11 = vunpack.c.h.bf16 %v2496_v9  ;;  %v767_v12 = vunpack.c.l.bf16 %v2496_v9 }
 0x131   : > { %v766_v14 = vunpack.c.h.bf16 %v2498_v10  ;;  %v765_v18 = vunpack.c.l.bf16 %v2498_v10 }
 0x132   : > { %1874 = vmatpush3.bf16.xpose.msra.mxu1 %v2432_v49  ;;  %849 = vadd.xlane.f32.xlu0 %v793_v7  ;;  %v800_v16 = vmul.f32 %v768_v11, %v768_v11  ;;  %v799_v17 = vmul.f32 %v767_v12, %v767_v12 }
 0x133   : > { %1898 = vmatpush3.bf16.xpose.msra.mxu0 %v2464_v26  ;;  %1923 = vmatprep.subr.bf16.mxu1 %v2390_v62  ;;  %v798_v53 = vmul.f32 %v766_v14, %v766_v14  ;;  %v797_v19 = vmul.f32 %v765_v18, %v765_v18 }
 0x134   : > { %1899 = vmatprep.subr.bf16.mxu0 %v2482_v50  ;;  %863 = vadd.xlane.f32.xlu1 %v800_v16 }
 0x136   : > { %861 = vadd.xlane.f32.xlu0 %v799_v17 }
 0x138   : > { %859 = vadd.xlane.f32.xlu1 %v798_v53 }
 0x139   : > { %1876 = vmatmul.mubr.bf16.vlgmr.msra.gmra.mrb[0].mxu1 %v2388_v61 }
 0x13a   : > { %1879 = vmatprep.mubr.bf16.mxu1 %v2406_v15  ;;  %1924 = vmatpush3.bf16.msra.mxu1 %v2390_v62 }
 0x13b   : > { %1900 = vmatpush3.bf16.xpose.msra.mxu0 %v2482_v50  ;;  %1925 = vmatprep.subr.bf16.mxu1 %v2388_v61 }
 0x13c   : > { %1901 = vmatprep.subr.bf16.mxu0 %v2480_v48  ;;  %857 = vadd.xlane.f32.xlu0 %v797_v19 }
 0x13e   : > { %1926 = vmatpush3.bf16.msra.mxu1 %v2388_v61 }
 0x13f   : > { %1927 = vmatprep.subr.bf16.mxu1 %v2406_v15 }
 0x141   : > { %1880 = vmatmul.mubr.bf16.gmra.mrb[4].mxu1 %v2404_v13 }
 0x142   : > { %1883 = vmatprep.mubr.bf16.mxu1 %v2420_v33  ;;  %1928 = vmatpush3.bf16.msra.mxu1 %v2406_v15 }
 0x143   : > { %1902 = vmatpush3.bf16.xpose.msra.mxu0 %v2480_v48  ;;  %1929 = vmatprep.subr.bf16.mxu1 %v2404_v13 }
 0x144   : > { %1903 = vmatprep.subr.bf16.mxu0 %v2498_v10 }
 0x146   : > { %1930 = vmatpush3.bf16.msra.mxu1 %v2404_v13 }
 0x147   : > { %1931 = vmatprep.subr.bf16.mxu1 %v2420_v33 }
 0x149   : > { %1884 = vmatmul.mubr.bf16.gmra.mrb[8].mxu1 %v2418_v31 }
 0x14a   : > { %1887 = vmatprep.mubr.bf16.mxu1 %v2434_v51  ;;  %1932 = vmatpush3.bf16.msra.mxu1 %v2420_v33 }
 0x14b   : > { %1904 = vmatpush3.bf16.xpose.msra.mxu0 %v2498_v10  ;;  %1933 = vmatprep.subr.bf16.mxu1 %v2418_v31 }
 0x14c   : > { %1905 = vmatprep.subr.bf16.mxu0 %v2496_v9 }
 0x14e   : > { %1934 = vmatpush3.bf16.msra.mxu1 %v2418_v31 }
 0x14f   : > { %1935 = vmatprep.subr.bf16.mxu1 %v2434_v51 }
 0x151   : > { %1888 = vmatmul.mubr.bf16.gmra.mrb[12].mxu1 %v2432_v49 }
 0x152   : > { %1936 = vmatpush3.bf16.msra.mxu1 %v2434_v51 }
 0x153   : > { %1906 = vmatpush3.bf16.xpose.msra.mxu0 %v2496_v9  ;;  %1937 = vmatprep.subr.bf16.mxu1 %v2432_v49 }
 0x154   : > { %1955 = vmatprep.subr.bf16.mxu0 %v2448_v8 }
 0x156   : > { %1938 = vmatpush3.bf16.msra.mxu1 %v2432_v49 }
 0x15a   : > { %1908 = vmatmul.mubr.bf16.vlgmr.msra.gmra.mrb[32].mxu0 %v2446_v6 }
 0x15b   : > { %1911 = vmatprep.mubr.bf16.mxu0 %v2466_v28  ;;  %1956 = vmatpush3.bf16.msra.mxu0 %v2448_v8 }
 0x15c   : > { %1957 = vmatprep.subr.bf16.mxu0 %v2446_v6 }
 0x15f   : > { %1958 = vmatpush3.bf16.msra.mxu0 %v2446_v6 }
 0x160   : > { %1959 = vmatprep.subr.bf16.mxu0 %v2466_v28 }
 0x162   : > { %1912 = vmatmul.mubr.bf16.gmra.mrb[36].mxu0 %v2464_v26 }
 0x163   : > { %1915 = vmatprep.mubr.bf16.mxu0 %v2482_v50  ;;  %1960 = vmatpush3.bf16.msra.mxu0 %v2466_v28 }
 0x164   : > { %1961 = vmatprep.subr.bf16.mxu0 %v2464_v26 }
 0x167   : > { %1962 = vmatpush3.bf16.msra.mxu0 %v2464_v26 }
 0x168   : > { %1963 = vmatprep.subr.bf16.mxu0 %v2482_v50 }
 0x16a   : > { %1916 = vmatmul.mubr.bf16.gmra.mrb[40].mxu0 %v2480_v48 }
 0x16b   : > { %1919 = vmatprep.mubr.bf16.mxu0 %v2498_v10  ;;  %1964 = vmatpush3.bf16.msra.mxu0 %v2482_v50 }
 0x16c   : > { %1965 = vmatprep.subr.bf16.mxu0 %v2480_v48 }
 0x16f   : > { %1966 = vmatpush3.bf16.msra.mxu0 %v2480_v48 }
 0x170   : > { %1967 = vmatprep.subr.bf16.mxu0 %v2498_v10 }
 0x172   : > { %1920 = vmatmul.mubr.bf16.gmra.mrb[44].mxu0 %v2496_v9 }
 0x173   : > { %1968 = vmatpush3.bf16.msra.mxu0 %v2498_v10 }
 0x174   : > { %1969 = vmatprep.subr.bf16.mxu0 %v2496_v9 }
 0x177   : > { %1970 = vmatpush3.bf16.msra.mxu0 %v2496_v9 }
 0x189   : > { %v806_v61 = vpop.xlane.xlu1 %805 }
 0x18a   : > { %v802_v62 = vpop.xlane.xlu0 %801  ;;  %v2566_v6 = vmul.f32 0.5, %v806_v61  ;;  %v2658_v61 = vld [vmem:[%s2902_s3] sm:$0xff]  }
 0x18b   : > { %v2560_v13 = vmul.f32 0.5, %v802_v62  ;;  %1987 = vmatprep.subr.bf16.mxu0 %v2658_v61  ;;  %2035 = vmatprep.subr.bf16.mxu1 %v2658_v61  ;;  %v961_v62 = vlaneseq }
 0x18d   : > { %v808_v15 = vpop.xlane.xlu1 %807  ;;  %897 = vxpose.xlu0.b32.start [1/16] (narrow) %v2560_v13, 8 }
 0x18e   : > { %v804_v31 = vpop.xlane.xlu0 %803  ;;  %v2569_v21 = vmul.f32 0.5, %v808_v15  ;;  %v2663_v15 = vshrl.u32 %v961_v62, 7 }
 0x18f   : > { %v2563_v33 = vmul.f32 0.5, %v804_v31 }
 0x190   : > { %v963_v31 = vsub.s32 0, %v2663_v15 }
 0x191   : > { %v816_v49 = vpop.xlane.xlu1 %815  ;;  %898 = vxpose.xlu0.b32.cont [2/16] (narrow) %v2563_v33, 8 }
 0x192   : > { %v814_v51 = vpop.xlane.xlu0 %813  ;;  %v2581_v34 = vmul.f32 0.5, %v816_v49 }
 0x193   : > { %v2578_v30 = vmul.f32 0.5, %v814_v51 }
 0x195   : > { %v812_v8 = vpop.xlane.xlu1 %811  ;;  %899 = vxpose.xlu0.b32.cont [3/16] (narrow) %v2566_v6, 8 }
 0x196   : > { %v810_v20 = vpop.xlane.xlu0 %809  ;;  %v2575_v27 = vmul.f32 0.5, %v812_v8 }
 0x197   : > { %v2572_v24 = vmul.f32 0.5, %v810_v20 }
 0x199   : > { %v824_v22 = vpop.xlane.xlu1 %823  ;;  %900 = vxpose.xlu0.b32.cont [4/16] (narrow) %v2569_v21, 8 }
 0x19a   : > { %v822_v23 = vpop.xlane.xlu0 %821  ;;  %v2599_v45 = vmul.f32 0.5, %v824_v22 }
 0x19b   : > { %v2593_v43 = vmul.f32 0.5, %v822_v23 }
 0x19d   : > { %v820_v25 = vpop.xlane.xlu1 %819  ;;  %901 = vxpose.xlu0.b32.cont [5/16] (narrow) %v2572_v24, 8 }
 0x19e   : > { %v818_v26 = vpop.xlane.xlu0 %817  ;;  %v2587_v39 = vmul.f32 0.5, %v820_v25 }
 0x19f   : > { %v2584_v36 = vmul.f32 0.5, %v818_v26 }
 0x1a1   : > { %v832_v28 = vpop.xlane.xlu1 %831  ;;  %902 = vxpose.xlu0.b32.cont [6/16] (narrow) %v2575_v27, 8 }
 0x1a2   : > { %v830_v29 = vpop.xlane.xlu0 %829  ;;  %v2623_v60 = vmul.f32 0.5, %v832_v28 }
 0x1a3   : > { %v2617_v58 = vmul.f32 0.5, %v830_v29 }
 0x1a5   : > { %v828_v32 = vpop.xlane.xlu1 %827  ;;  %903 = vxpose.xlu0.b32.cont [7/16] (narrow) %v2578_v30, 8 }
 0x1a6   : > { %v2611_v55 = vmul.f32 0.5, %v828_v32 }
 0x1a7   : > { %v826_v35 = vpop.xlane.xlu0 %825 }
 0x1a8   : > { %v2605_v48 = vmul.f32 0.5, %v826_v35 }
 0x1a9   : > { %904 = vxpose.xlu0.b32.cont [8/16] (narrow) %v2581_v34, 8  ;;  %v840_v37 = vpop.xlane.xlu1 %839 }
 0x1aa   : > { %v2607_v52 = vmul.f32 0.5, %v840_v37 }
 0x1ab   : > { %v838_v38 = vpop.xlane.xlu0 %837 }
 0x1ac   : > { %v2601_v47 = vmul.f32 0.5, %v838_v38 }
 0x1ad   : > { %905 = vxpose.xlu0.b32.cont [9/16] (narrow) %v2584_v36, 8  ;;  %v836_v42 = vpop.xlane.xlu1 %835 }
 0x1ae   : > { %v2595_v44 = vmul.f32 0.5, %v836_v42 }
 0x1af   : > { %v834_v40 = vpop.xlane.xlu0 %833 }
 0x1b0   : > { %v2589_v41 = vmul.f32 0.5, %v834_v40 }
 0x1b1   : > { %906 = vxpose.xlu0.b32.cont [10/16] (narrow) %v2587_v39, 8  ;;  %v848_v50 = vpop.xlane.xlu1 %847 }
 0x1b2   : > { %929 = vxpose.xlu1.b32.start [1/16] (narrow) %v2589_v41, 8  ;;  %v2629_v2 = vmul.f32 0.5, %v848_v50 }
 0x1b3   : > { %v846_v46 = vpop.xlane.xlu0 %845 }
 0x1b4   : > { %v2625_v0 = vmul.f32 0.5, %v846_v46 }
 0x1b5   : > { %907 = vxpose.xlu0.b32.cont [11/16] (narrow) %v2593_v43, 8  ;;  %v844_v57 = vpop.xlane.xlu1 %843 }
 0x1b6   : > { %930 = vxpose.xlu1.b32.cont [2/16] (narrow) %v2595_v44, 8  ;;  %v2619_v59 = vmul.f32 0.5, %v844_v57 }
 0x1b7   : > { %v842_v54 = vpop.xlane.xlu0 %841 }
 0x1b8   : > { %v2613_v56 = vmul.f32 0.5, %v842_v54 }
 0x1b9   : > { %908 = vxpose.xlu0.b32.cont [12/16] (narrow) %v2599_v45, 8  ;;  %v856_v1 = vpop.xlane.xlu1 %855 }
 0x1ba   : > { %931 = vxpose.xlu1.b32.cont [3/16] (narrow) %v2601_v47, 8  ;;  %v2641_v12 = vmul.f32 0.5, %v856_v1 }
 0x1bb   : > { %v854_v63 = vpop.xlane.xlu0 %853 }
 0x1bc   : > { %v2638_v10 = vmul.f32 0.5, %v854_v63 }
 0x1bd   : > { %909 = vxpose.xlu0.b32.cont [13/16] (narrow) %v2605_v48, 8  ;;  %v852_v5 = vpop.xlane.xlu1 %851 }
 0x1be   : > { %932 = vxpose.xlu1.b32.cont [4/16] (narrow) %v2607_v52, 8  ;;  %v2635_v7 = vmul.f32 0.5, %v852_v5 }
 0x1bf   : > { %v850_v3 = vpop.xlane.xlu0 %849 }
 0x1c0   : > { %v2632_v4 = vmul.f32 0.5, %v850_v3 }
 0x1c1   : > { %910 = vxpose.xlu0.b32.cont [14/16] (narrow) %v2611_v55, 8  ;;  %v864_v11 = vpop.xlane.xlu1 %863 }
 0x1c2   : > { %933 = vxpose.xlu1.b32.cont [5/16] (narrow) %v2613_v56, 8  ;;  %v2653_v19 = vmul.f32 0.5, %v864_v11 }
 0x1c3   : > { %v862_v9 = vpop.xlane.xlu0 %861 }
 0x1c4   : > { %v2650_v18 = vmul.f32 0.5, %v862_v9 }
 0x1c5   : > { %911 = vxpose.xlu0.b32.cont [15/16] (narrow) %v2617_v58, 8  ;;  %v860_v17 = vpop.xlane.xlu1 %859 }
 0x1c6   : > { %934 = vxpose.xlu1.b32.cont [6/16] (narrow) %v2619_v59, 8  ;;  %v2647_v53 = vmul.f32 0.5, %v860_v17 }
 0x1c9   : > { %912 = vxpose.xlu0.b32.end [16/16] (narrow) %v2623_v60, 8  ;;  %v858_v14 = vpop.xlane.xlu0 %857 }
 0x1ca   : > { %935 = vxpose.xlu1.b32.cont [7/16] (narrow) %v2625_v0, 8  ;;  %v2644_v16 = vmul.f32 0.5, %v858_v14 }
 0x1ce   : > { %936 = vxpose.xlu1.b32.cont [8/16] (narrow) %v2629_v2, 8 }
 0x1d2   : > { %937 = vxpose.xlu1.b32.cont [9/16] (narrow) %v2632_v4, 8 }
 0x1d6   : > { %938 = vxpose.xlu1.b32.cont [10/16] (narrow) %v2635_v7, 8 }
 0x1da   : > { %939 = vxpose.xlu1.b32.cont [11/16] (narrow) %v2638_v10, 8 }
 0x1de   : > { %940 = vxpose.xlu1.b32.cont [12/16] (narrow) %v2641_v12, 8 }
 0x1e2   : > { %941 = vxpose.xlu1.b32.cont [13/16] (narrow) %v2644_v16, 8 }
 0x1e6   : > { %942 = vxpose.xlu1.b32.cont [14/16] (narrow) %v2647_v53, 8 }
 0x1ea   : > { %943 = vxpose.xlu1.b32.cont [15/16] (narrow) %v2650_v18, 8 }
 0x1ee   : > { %944 = vxpose.xlu1.b32.end [16/16] (narrow) %v2653_v19, 8 }
 0x20c   : > { %v1877_v49 = vpop.f32.mrb[0].mxu1 }
 0x20d   : > { %v913_v51 = vpop.trf.xlu0  ;;  %v577_v8 = vpop.f32.mrb[1].mxu1 }
 0x20e   : > { %v964_v20 = vrot.slane %v913_v51, %v963_v31  ;;  %v1878_v22 = vpop.f32.mrb[2].mxu1 }
 0x20f   : > { %v580_v23 = vpop.f32.mrb[3].mxu1 }
 0x210   : > { %v969_v25 = vadd.f32 %v964_v20, %v2560_v13  ;;  %v971_v26 = vadd.f32 %v964_v20, %v2566_v6  ;;  %v972_v28 = vadd.f32 %v964_v20, %v2569_v21  ;;  %v970_v29 = vadd.f32 %v964_v20, %v2563_v33 }
 0x211   : > { %v975_v32 = vadd.f32 %v964_v20, %v2578_v30  ;;  %v973_v35 = vadd.f32 %v964_v20, %v2572_v24  ;;  %v976_v38 = vadd.f32 %v964_v20, %v2581_v34  ;;  %v974_v13 = vadd.f32 %v964_v20, %v2575_v27 }
 0x212   : > { %2104 = vrcp.f32 %v969_v25  ;;  %v979_v21 = vadd.f32 %v964_v20, %v2593_v43  ;;  %v977_v42 = vadd.f32 %v964_v20, %v2584_v36  ;;  %v980_v30 = vadd.f32 %v964_v20, %v2599_v45 }
 0x213   : > { %2106 = vrcp.f32 %v971_v26  ;;  %v978_v24 = vadd.f32 %v964_v20, %v2587_v39  ;;  %v983_v34 = vadd.f32 %v964_v20, %v2617_v58  ;;  %v981_v27 = vadd.f32 %v964_v20, %v2605_v48 }
 0x214   : > { %2108 = vrcp.f32 %v972_v28  ;;  %v1881_v37 = vpop.f32.mrb[4].mxu1  ;;  %v984_v43 = vadd.f32 %v964_v20, %v2623_v60  ;;  %v982_v36 = vadd.f32 %v964_v20, %v2611_v55 }
 0x215   : > { %2110 = vrcp.f32 %v970_v29  ;;  %v593_v40 = vpop.f32.mrb[5].mxu1 }
 0x216   : > { %2112 = vrcp.f32 %v975_v32  ;;  %v1882_v6 = vpop.f32.mrb[6].mxu1 }
 0x217   : > { %2114 = vrcp.f32 %v973_v35  ;;  %v596_v33 = vpop.f32.mrb[7].mxu1 }
 0x218   : > { %2116 = vrcp.f32 %v976_v38 }
 0x219   : > { %2118 = vrcp.f32 %v974_v13 }
 0x21a   : > { %2120 = vrcp.f32 %v979_v21 }
 0x21b   : > { %2122 = vrcp.f32 %v977_v42 }
 0x21c   : > { %v2105_v46 = vpop.eup %2104  ;;  %v1885_v50 = vpop.f32.mrb[8].mxu1  ;;  %2124 = vrcp.f32 %v980_v30 }
 0x21d   : > { %v2107_v54 = vpop.eup %2106  ;;  %v609_v57 = vpop.f32.mrb[9].mxu1  ;;  %2126 = vrcp.f32 %v978_v24  ;;  %v1033_v63 = vmul.f32 %v2105_v46, %v577_v8  ;;  %v2694_v24 = vld [vmem:[%s2902_s3 + $0x10] sm:$0xff]  }
 0x21e   : > { %v2109_v45 = vpop.eup %2108  ;;  %v1035_v1 = vmul.f32 %v2107_v54, %v1877_v49  ;;  %v1886_v39 = vpop.f32.mrb[10].mxu1  ;;  %2128 = vrcp.f32 %v983_v34 }
 0x21f   : > { %v2111_v3 = vpop.eup %2110  ;;  %v1036_v58 = vmul.f32 %v2109_v45, %v1878_v22  ;;  %v612_v5 = vpop.f32.mrb[11].mxu1  ;;  %2130 = vrcp.f32 %v981_v27 }
 0x220   : > { %v2113_v48 = vpop.eup %2112  ;;  %v1034_v9 = vmul.f32 %v2111_v3, %v580_v23  ;;  %2132 = vrcp.f32 %v984_v43  ;;  %v2687_v23 = vld [vmem:[%s2902_s3 + $0x8] sm:$0xff]  }
 0x221   : > { %v2115_v11 = vpop.eup %2114  ;;  %v1066_v14 = vpack.c.bf16 %v1036_v58, %v1035_v1  ;;  %v1039_v60 = vmul.f32 %v2113_v48, %v1881_v37  ;;  %2134 = vrcp.f32 %v982_v36 }
 0x222   : > { %v2117_v17 = vpop.eup %2116  ;;  %v1065_v62 = vpack.c.bf16 %v1034_v9, %v1033_v63  ;;  %v1037_v51 = vmul.f32 %v2115_v11, %v593_v40  ;;  %v2703_v63 = vld [vmem:[%s2902_s3 + $0x18] sm:$0xff]  }
 0x223   : > { %v2119_v55 = vpop.eup %2118  ;;  %v1040_v20 = vmul.f32 %v2117_v17, %v1882_v6 }
 0x224   : > { %v2121_v8 = vpop.eup %2120  ;;  %v1038_v49 = vmul.f32 %v2119_v55, %v596_v33  ;;  %1939 = vmatprep.mubr.bf16.mxu1 %v1065_v62  ;;  %v1889_v25 = vpop.f32.mrb[12].mxu1  ;;  %v2729_v55 = vld [vmem:[%s2902_s3 + $0x28] sm:$0xff]  }
 0x225   : > { %v2123_v26 = vpop.eup %2122  ;;  %v1068_v22 = vpack.c.bf16 %v1040_v20, %v1039_v60  ;;  %1940 = vmatmul.mubr.bf16.vlgmr.msra.gmra.mrb[16].mxu1 %v1066_v14  ;;  %v625_v28 = vpop.f32.mrb[13].mxu1  ;;  %v1043_v38 = vmul.f32 %v2121_v8, %v1885_v50  ;;  %v2740_v20 = vld [vmem:[%s2902_s3 + $0x30] sm:$0xff]  }
 0x226   : > { %v2125_v29 = vpop.eup %2124  ;;  %v1067_v32 = vpack.c.bf16 %v1038_v49, %v1037_v51  ;;  %v1890_v35 = vpop.f32.mrb[14].mxu1  ;;  %2043 = vmatpush3.bf16.msra.mxu1 %v2658_v61  ;;  %v1041_v21 = vmul.f32 %v2123_v26, %v609_v57 }
 0x227   : > { %v2127_v37 = vpop.eup %2126  ;;  %v1044_v40 = vmul.f32 %v2125_v29, %v1886_v39  ;;  %v628_v13 = vpop.f32.mrb[15].mxu1  ;;  %2036 = vmatprep.subr.bf16.mxu1 %v2687_v23 }
 0x228   : > { %v2129_v6 = vpop.eup %2128  ;;  %v1042_v33 = vmul.f32 %v2127_v37, %v612_v5  ;;  %1943 = vmatprep.mubr.bf16.mxu1 %v1067_v32  ;;  %v2716_v5 = vld [vmem:[%s2902_s3 + $0x20] sm:$0xff]  }
 0x229   : > { %v2131_v42 = vpop.eup %2130  ;;  %v1070_v30 = vpack.c.bf16 %v1044_v40, %v1043_v38  ;;  %v1047_v50 = vmul.f32 %v2129_v6, %v1889_v25 }
 0x22a   : > { %v2133_v34 = vpop.eup %2132  ;;  %v1069_v27 = vpack.c.bf16 %v1042_v33, %v1041_v21  ;;  %2044 = vmatpush3.bf16.msra.mxu1 %v2687_v23  ;;  %v1045_v54 = vmul.f32 %v2131_v42, %v625_v28 }
 0x22b   : > { %v2135_v46 = vpop.eup %2134  ;;  %v1048_v43 = vmul.f32 %v2133_v34, %v1890_v35  ;;  %2037 = vmatprep.subr.bf16.mxu1 %v2694_v24 }
 0x22c   : > { %v1046_v57 = vmul.f32 %v2135_v46, %v628_v13 }
 0x22d   : > { %v1072_v36 = vpack.c.bf16 %v1048_v43, %v1047_v50  ;;  %1944 = vmatmul.mubr.bf16.gmra.mrb[20].mxu1 %v1068_v22  ;;  %v2698_v45 = vpop.f32.mrb[32].mxu0 }
 0x22e   : > { %v1071_v1 = vpack.c.bf16 %v1046_v57, %v1045_v54  ;;  %1947 = vmatprep.mubr.bf16.mxu1 %v1069_v27  ;;  %v2705_v39 = vpop.f32.mrb[33].mxu0  ;;  %2045 = vmatpush3.bf16.msra.mxu1 %v2694_v24 }
 0x22f   : > { %v2708_v3 = vpop.f32.mrb[34].mxu0  ;;  %2038 = vmatprep.subr.bf16.mxu1 %v2703_v63 }
 0x230   : > { %v2711_v58 = vpop.f32.mrb[35].mxu0 }
 0x232   : > { %v945_v48 = vpop.trf.xlu1  ;;  %2046 = vmatpush3.bf16.msra.mxu1 %v2703_v63 }
 0x233   : > { %v968_v9 = vrot.slane %v945_v48, %v963_v31  ;;  %2039 = vmatprep.subr.bf16.mxu1 %v2716_v5 }
 0x235   : > { %1948 = vmatmul.mubr.bf16.gmra.mrb[24].mxu1 %v1070_v30  ;;  %v1913_v11 = vpop.f32.mrb[36].mxu0  ;;  %v991_v14 = vadd.f32 %v968_v9, %v2625_v0  ;;  %v989_v60 = vadd.f32 %v968_v9, %v2613_v56  ;;  %v992_v17 = vadd.f32 %v968_v9, %v2629_v2  ;;  %v990_v51 = vadd.f32 %v968_v9, %v2619_v59 }
 0x236   : > { %1951 = vmatprep.mubr.bf16.mxu1 %v1071_v1  ;;  %v690_v62 = vpop.f32.mrb[37].mxu0  ;;  %v995_v31 = vadd.f32 %v968_v9, %v2638_v10  ;;  %2047 = vmatpush3.bf16.msra.mxu1 %v2716_v5  ;;  %v993_v56 = vadd.f32 %v968_v9, %v2632_v4  ;;  %v996_v59 = vadd.f32 %v968_v9, %v2641_v12 }
 0x237   : > { %2136 = vrcp.f32 %v991_v14  ;;  %v1914_v15 = vpop.f32.mrb[38].mxu0  ;;  %2040 = vmatprep.subr.bf16.mxu1 %v2729_v55  ;;  %v994_v2 = vadd.f32 %v968_v9, %v2635_v7  ;;  %v999_v10 = vadd.f32 %v968_v9, %v2650_v18  ;;  %v997_v4 = vadd.f32 %v968_v9, %v2644_v16 }
 0x238   : > { %2138 = vrcp.f32 %v989_v60  ;;  %v693_v0 = vpop.f32.mrb[39].mxu0  ;;  %v985_v7 = vadd.f32 %v968_v9, %v2589_v41  ;;  %v986_v49 = vadd.f32 %v968_v9, %v2595_v44  ;;  %v1000_v18 = vadd.f32 %v968_v9, %v2653_v19 }
 0x239   : > { %2140 = vrcp.f32 %v992_v17  ;;  %v987_v16 = vadd.f32 %v968_v9, %v2601_v47  ;;  %v988_v28 = vadd.f32 %v968_v9, %v2607_v52  ;;  %v998_v32 = vadd.f32 %v968_v9, %v2647_v53 }
 0x23a   : > { %2142 = vrcp.f32 %v990_v51  ;;  %2048 = vmatpush3.bf16.msra.mxu1 %v2729_v55 }
 0x23b   : > { %2144 = vrcp.f32 %v995_v31  ;;  %2041 = vmatprep.subr.bf16.mxu1 %v2740_v20 }
 0x23c   : > { %2146 = vrcp.f32 %v993_v56 }
 0x23d   : > { %1952 = vmatmul.mubr.bf16.gmra.mrb[28].mxu1 %v1072_v36  ;;  %v1917_v12 = vpop.f32.mrb[40].mxu0  ;;  %2148 = vrcp.f32 %v996_v59 }
 0x23e   : > { %v706_v8 = vpop.f32.mrb[41].mxu0  ;;  %2150 = vrcp.f32 %v994_v2  ;;  %2049 = vmatpush3.bf16.msra.mxu1 %v2740_v20 }
 0x23f   : > { %v1918_v25 = vpop.f32.mrb[42].mxu0  ;;  %2152 = vrcp.f32 %v999_v10 }
 0x240   : > { %v709_v26 = vpop.f32.mrb[43].mxu0  ;;  %2154 = vrcp.f32 %v997_v4 }
 0x241   : > { %v2137_v22 = vpop.eup %2136  ;;  %2156 = vrcp.f32 %v985_v7 }
 0x242   : > { %v2139_v29 = vpop.eup %2138  ;;  %v1055_v41 = vmul.f32 %v2137_v22, %v1913_v11  ;;  %2158 = vrcp.f32 %v986_v49 }
 0x243   : > { %v2141_v44 = vpop.eup %2140  ;;  %v1053_v35 = vmul.f32 %v2139_v29, %v690_v62  ;;  %2160 = vrcp.f32 %v1000_v18 }
 0x244   : > { %v2143_v37 = vpop.eup %2142  ;;  %v1056_v19 = vmul.f32 %v2141_v44, %v1914_v15  ;;  %2162 = vrcp.f32 %v987_v16 }
 0x245   : > { %v2145_v38 = vpop.eup %2144  ;;  %v1054_v40 = vmul.f32 %v2143_v37, %v693_v0  ;;  %v1921_v13 = vpop.f32.mrb[44].mxu0  ;;  %2164 = vrcp.f32 %v988_v28 }
 0x246   : > { %v2147_v47 = vpop.eup %2146  ;;  %v1076_v6 = vpack.c.bf16 %v1056_v19, %v1055_v41  ;;  %v1059_v21 = vmul.f32 %v2145_v38, %v1917_v12  ;;  %v722_v33 = vpop.f32.mrb[45].mxu0  ;;  %2166 = vrcp.f32 %v998_v32 }
 0x247   : > { %v2149_v52 = vpop.eup %2148  ;;  %v1075_v42 = vpack.c.bf16 %v1054_v40, %v1053_v35  ;;  %v1057_v30 = vmul.f32 %v2147_v47, %v706_v8  ;;  %v1922_v34 = vpop.f32.mrb[46].mxu0 }
 0x248   : > { %v2151_v53 = vpop.eup %2150  ;;  %v1060_v27 = vmul.f32 %v2149_v52, %v1918_v25  ;;  %v725_v46 = vpop.f32.mrb[47].mxu0 }
 0x249   : > { %v2153_v50 = vpop.eup %2152  ;;  %v1058_v43 = vmul.f32 %v2151_v53, %v709_v26 }
 0x24a   : > { %v2155_v54 = vpop.eup %2154  ;;  %v1078_v57 = vpack.c.bf16 %v1060_v27, %v1059_v21  ;;  %v1063_v17 = vmul.f32 %v2153_v50, %v1921_v13 }
 0x24b   : > { %v2157_v36 = vpop.eup %2156  ;;  %v1077_v1 = vpack.c.bf16 %v1058_v43, %v1057_v30  ;;  %v1061_v2 = vmul.f32 %v2155_v54, %v722_v33 }
 0x24c   : > { %v2159_v48 = vpop.eup %2158  ;;  %v1049_v9 = vmul.f32 %v2157_v36, %v2705_v39 }
 0x24d   : > { %v2161_v11 = vpop.eup %2160  ;;  %v1050_v14 = vmul.f32 %v2159_v48, %v2711_v58 }
 0x24e   : > { %v2163_v60 = vpop.eup %2162  ;;  %v1064_v62 = vmul.f32 %v2161_v11, %v1922_v34  ;;  %v2777_v11 = vld [vmem:[%s2903_s4] ss:$0 sm:$0xff] }
 0x24f   : > { %v2165_v51 = vpop.eup %2164  ;;  %v1073_v15 = vpack.c.bf16 %v1050_v14, %v1049_v9  ;;  %v1051_v31 = vmul.f32 %v2163_v60, %v2698_v45 }
 0x250   : > { %v2167_v0 = vpop.eup %2166  ;;  %v1080_v56 = vpack.c.bf16 %v1064_v62, %v1063_v17  ;;  %v1052_v59 = vmul.f32 %v2165_v51, %v2708_v3 }
 0x251   : > { %1971 = vmatprep.mubr.bf16.mxu0 %v1073_v15  ;;  %v1062_v10 = vmul.f32 %v2167_v0, %v725_v46 }
 0x252   : > { %v1074_v4 = vpack.c.bf16 %v1052_v59, %v1051_v31 }
 0x253   : > { %v1079_v12 = vpack.c.bf16 %v1062_v10, %v1061_v2 }
 0x254   : > { %1972 = vmatmul.mubr.bf16.vlgmr.msra.gmra.mrb[48].mxu0 %v1074_v4 }
 0x255   : > { %1975 = vmatprep.mubr.bf16.mxu0 %v1075_v42  ;;  %1988 = vmatpush3.bf16.msra.mxu0 %v2658_v61  ;;  %v2103_v61 = vld [vmem:[%s2902_s3 + $0x38] sm:$0xff]  }
 0x256   : > { %1989 = vmatprep.subr.bf16.mxu0 %v2687_v23  ;;  %2042 = vmatprep.subr.bf16.mxu1 %v2103_v61 }
 0x257   : > { %2050 = vmatpush3.bf16.msra.mxu1 %v2103_v61 }
 0x259   : > { %1990 = vmatpush3.bf16.msra.mxu0 %v2687_v23 }
 0x25a   : > { %1991 = vmatprep.subr.bf16.mxu0 %v2694_v24 }
 0x25c   : > { %1976 = vmatmul.mubr.bf16.gmra.mrb[52].mxu0 %v1076_v6 }
 0x25d   : > { %1979 = vmatprep.mubr.bf16.mxu0 %v1077_v1  ;;  %1992 = vmatpush3.bf16.msra.mxu0 %v2694_v24 }
 0x25e   : > { %1993 = vmatprep.subr.bf16.mxu0 %v2703_v63 }
 0x261   : > { %1994 = vmatpush3.bf16.msra.mxu0 %v2703_v63 }
 0x262   : > { %1995 = vmatprep.subr.bf16.mxu0 %v2716_v5 }
 0x264   : > { %1980 = vmatmul.mubr.bf16.gmra.mrb[56].mxu0 %v1078_v57 }
 0x265   : > { %1983 = vmatprep.mubr.bf16.mxu0 %v1079_v12  ;;  %1996 = vmatpush3.bf16.msra.mxu0 %v2716_v5 }
 0x266   : > { %1997 = vmatprep.subr.bf16.mxu0 %v2729_v55 }
 0x269   : > { %1998 = vmatpush3.bf16.msra.mxu0 %v2729_v55 }
 0x26a   : > { %1999 = vmatprep.subr.bf16.mxu0 %v2740_v20 }
 0x26c   : > { %1984 = vmatmul.mubr.bf16.gmra.mrb[60].mxu0 %v1080_v56 }
 0x26d   : > { %2000 = vmatpush3.bf16.msra.mxu0 %v2740_v20 }
 0x26e   : > { %2001 = vmatprep.subr.bf16.mxu0 %v2103_v61 }
 0x271   : > { %2002 = vmatpush3.bf16.msra.mxu0 %v2103_v61 }
 0x2f8   : > { %v1941_v23 = vpop.f32.mrb[16].mxu1 }
 0x2f9   : > { %v1116_v24 = vpop.f32.mrb[17].mxu1 }
 0x2fa   : > { %v1942_v45 = vpop.f32.mrb[18].mxu1 }
 0x2fb   : > { %v1277_v63 = vpack.c.bf16 %v1942_v45, %v1941_v23  ;;  %v1119_v39 = vpop.f32.mrb[19].mxu1 }
 0x2fc   : > { %v1276_v3 = vpack.c.bf16 %v1119_v39, %v1116_v24 }
 0x2fe   : > { %2003 = vmatprep.mubr.bf16.mxu0 %v1276_v3 }
 0x2ff   : > { %2004 = vmatmul.mubr.bf16.vlgmr.msra.gmra.mrb[64].mxu0 %v1277_v63 }
 0x300   : > { %v1945_v58 = vpop.f32.mrb[20].mxu1 }
 0x301   : > { %v1132_v5 = vpop.f32.mrb[21].mxu1 }
 0x302   : > { %v1946_v55 = vpop.f32.mrb[22].mxu1 }
 0x303   : > { %v1279_v20 = vpack.c.bf16 %v1946_v55, %v1945_v58  ;;  %v1135_v7 = vpop.f32.mrb[23].mxu1 }
 0x304   : > { %v1278_v8 = vpack.c.bf16 %v1135_v7, %v1132_v5 }
 0x306   : > { %2007 = vmatprep.mubr.bf16.mxu0 %v1278_v8 }
 0x307   : > { %2008 = vmatmul.mubr.bf16.gmra.mrb[68].mxu0 %v1279_v20 }
 0x308   : > { %v1949_v49 = vpop.f32.mrb[24].mxu1 }
 0x309   : > { %v1148_v25 = vpop.f32.mrb[25].mxu1 }
 0x30a   : > { %v1950_v18 = vpop.f32.mrb[26].mxu1 }
 0x30b   : > { %v1281_v26 = vpack.c.bf16 %v1950_v18, %v1949_v49  ;;  %v1151_v16 = vpop.f32.mrb[27].mxu1 }
 0x30c   : > { %v1280_v22 = vpack.c.bf16 %v1151_v16, %v1148_v25 }
 0x30e   : > { %2011 = vmatprep.mubr.bf16.mxu0 %v1280_v22 }
 0x30f   : > { %2012 = vmatmul.mubr.bf16.gmra.mrb[72].mxu0 %v1281_v26 }
 0x310   : > { %v1953_v28 = vpop.f32.mrb[28].mxu1 }
 0x311   : > { %v1164_v29 = vpop.f32.mrb[29].mxu1 }
 0x312   : > { %v1954_v41 = vpop.f32.mrb[30].mxu1 }
 0x313   : > { %v1283_v32 = vpack.c.bf16 %v1954_v41, %v1953_v28  ;;  %v1167_v44 = vpop.f32.mrb[31].mxu1 }
 0x314   : > { %v1282_v35 = vpack.c.bf16 %v1167_v44, %v1164_v29 }
 0x316   : > { %2015 = vmatprep.mubr.bf16.mxu1 %v1282_v35 }
 0x317   : > { %2016 = vmatmul.mubr.bf16.vlgmr.msra.gmra.mrb[32].mxu1 %v1283_v32 }
 0x327   : > { %v1973_v37 = vpop.f32.mrb[48].mxu0 }
 0x328   : > { %v1213_v19 = vpop.f32.mrb[49].mxu0 }
 0x329   : > { %v1974_v38 = vpop.f32.mrb[50].mxu0 }
 0x32a   : > { %v1285_v40 = vpack.c.bf16 %v1974_v38, %v1973_v37  ;;  %v1216_v13 = vpop.f32.mrb[51].mxu0 }
 0x32b   : > { %v1284_v47 = vpack.c.bf16 %v1216_v13, %v1213_v19 }
 0x32d   : > { %2019 = vmatprep.mubr.bf16.mxu1 %v1284_v47 }
 0x32e   : > { %2020 = vmatmul.mubr.bf16.gmra.mrb[36].mxu1 %v1285_v40 }
 0x32f   : > { %v1977_v6 = vpop.f32.mrb[52].mxu0 }
 0x330   : > { %v1229_v21 = vpop.f32.mrb[53].mxu0 }
 0x331   : > { %v1978_v33 = vpop.f32.mrb[54].mxu0 }
 0x332   : > { %v1287_v52 = vpack.c.bf16 %v1978_v33, %v1977_v6  ;;  %v1232_v42 = vpop.f32.mrb[55].mxu0 }
 0x333   : > { %v1286_v30 = vpack.c.bf16 %v1232_v42, %v1229_v21 }
 0x335   : > { %2023 = vmatprep.mubr.bf16.mxu1 %v1286_v30 }
 0x336   : > { %2024 = vmatmul.mubr.bf16.gmra.mrb[40].mxu1 %v1287_v52 }
 0x337   : > { %v1981_v34 = vpop.f32.mrb[56].mxu0 }
 0x338   : > { %v1245_v53 = vpop.f32.mrb[57].mxu0 }
 0x339   : > { %v1982_v27 = vpop.f32.mrb[58].mxu0 }
 0x33a   : > { %v1289_v46 = vpack.c.bf16 %v1982_v27, %v1981_v34  ;;  %v1248_v50 = vpop.f32.mrb[59].mxu0 }
 0x33b   : > { %v1288_v43 = vpack.c.bf16 %v1248_v50, %v1245_v53 }
 0x33d   : > { %2027 = vmatprep.mubr.bf16.mxu1 %v1288_v43 }
 0x33e   : > { %2028 = vmatmul.mubr.bf16.gmra.mrb[44].mxu1 %v1289_v46 }
 0x33f   : > { %v1985_v54 = vpop.f32.mrb[60].mxu0 }
 0x340   : > { %v1261_v57 = vpop.f32.mrb[61].mxu0 }
 0x341   : > { %v1986_v36 = vpop.f32.mrb[62].mxu0 }
 0x342   : > { %v1291_v1 = vpack.c.bf16 %v1986_v36, %v1985_v54  ;;  %v1264_v48 = vpop.f32.mrb[63].mxu0 }
 0x343   : > { %v1290_v9 = vpack.c.bf16 %v1264_v48, %v1261_v57 }
 0x345   : > { %2031 = vmatprep.mubr.bf16.mxu1 %v1290_v9 }
 0x346   : > { %2032 = vmatmul.mubr.bf16.gmra.mrb[48].mxu1 %v1291_v1 }
 0x3d2   : > { %v2005_v14 = vpop.f32.mrb[64].mxu0 }
 0x3d3   : > { %v1405_v60 = vadd.f32 %v2005_v14, %v2777_v11  ;;  %v1396_v17 = vpop.f32.mrb[65].mxu0 }
 0x3d4   : > { %v1397_v62 = vadd.f32 %v2777_v11, %v1396_v17  ;;  %v2006_v51 = vpop.f32.mrb[66].mxu0 }
 0x3d5   : > { %v1525_v15 = vmax.f32 %v1405_v60, 0.0  ;;  %v1408_v31 = vadd.f32 %v2006_v51, %v2777_v11  ;;  %v1399_v0 = vpop.f32.mrb[67].mxu0 }
 0x3d6   : > { %v1523_v56 = vmax.f32 %v1397_v62, 0.0  ;;  %v1400_v59 = vadd.f32 %v2777_v11, %v1399_v0 }
 0x3d7   : > { %1557 = vst [vmem:[%s2785_s8 + $0x10] sm:$0xff] %v1525_v15  ;;  %v1526_v2 = vmax.f32 %v1408_v31, 0.0 }
 0x3d8   : > { %1555 = vst [vmem:[%s2785_s8] sm:$0xff] %v1523_v56  ;;  %v1524_v10 = vmax.f32 %v1400_v59, 0.0 }
 0x3d9   : > { %1558 = vst [vmem:[%s2785_s8 + $0x18] sm:$0xff] %v1526_v2 }
 0x3da   : > { %1556 = vst [vmem:[%s2785_s8 + $0x8] sm:$0xff] %v1524_v10  ;;  %v2009_v4 = vpop.f32.mrb[68].mxu0 }
 0x3db   : > { %v1421_v12 = vadd.f32 %v2009_v4, %v2777_v11  ;;  %v1412_v61 = vpop.f32.mrb[69].mxu0 }
 0x3dc   : > { %v1413_v23 = vadd.f32 %v2777_v11, %v1412_v61  ;;  %v2010_v24 = vpop.f32.mrb[70].mxu0 }
 0x3dd   : > { %v1529_v45 = vmax.f32 %v1421_v12, 0.0  ;;  %v1424_v63 = vadd.f32 %v2010_v24, %v2777_v11  ;;  %v1415_v39 = vpop.f32.mrb[71].mxu0 }
 0x3de   : > { %v1527_v3 = vmax.f32 %v1413_v23, 0.0  ;;  %v1416_v58 = vadd.f32 %v2777_v11, %v1415_v39 }
 0x3df   : > { %1561 = vst [vmem:[%s2785_s8 + $0x30] sm:$0xff] %v1529_v45  ;;  %v1530_v5 = vmax.f32 %v1424_v63, 0.0 }
 0x3e0   : > { %1559 = vst [vmem:[%s2785_s8 + $0x20] sm:$0xff] %v1527_v3  ;;  %v1528_v55 = vmax.f32 %v1416_v58, 0.0 }
 0x3e1   : > { %1562 = vst [vmem:[%s2785_s8 + $0x38] sm:$0xff] %v1530_v5 }
 0x3e2   : > { %1560 = vst [vmem:[%s2785_s8 + $0x28] sm:$0xff] %v1528_v55  ;;  %v2013_v20 = vpop.f32.mrb[72].mxu0 }
 0x3e3   : > { %v1437_v7 = vadd.f32 %v2013_v20, %v2777_v11  ;;  %v1428_v8 = vpop.f32.mrb[73].mxu0 }
 0x3e4   : > { %v1429_v49 = vadd.f32 %v2777_v11, %v1428_v8  ;;  %v2014_v25 = vpop.f32.mrb[74].mxu0 }
 0x3e5   : > { %v1533_v18 = vmax.f32 %v1437_v7, 0.0  ;;  %v1440_v26 = vadd.f32 %v2014_v25, %v2777_v11  ;;  %v1431_v16 = vpop.f32.mrb[75].mxu0 }
 0x3e6   : > { %v1531_v22 = vmax.f32 %v1429_v49, 0.0  ;;  %v1432_v28 = vadd.f32 %v2777_v11, %v1431_v16 }
 0x3e7   : > { %1565 = vst [vmem:[%s2785_s8 + $0x50] sm:$0xff] %v1533_v18  ;;  %v1534_v29 = vmax.f32 %v1440_v26, 0.0 }
 0x3e8   : > { %1563 = vst [vmem:[%s2785_s8 + $0x40] sm:$0xff] %v1531_v22  ;;  %v1532_v41 = vmax.f32 %v1432_v28, 0.0 }
 0x3e9   : > { %1566 = vst [vmem:[%s2785_s8 + $0x58] sm:$0xff] %v1534_v29 }
 0x3ea   : > { %1564 = vst [vmem:[%s2785_s8 + $0x48] sm:$0xff] %v1532_v41  ;;  %v2017_v32 = vpop.f32.mrb[32].mxu1 }
 0x3eb   : > { %v1453_v44 = vadd.f32 %v2017_v32, %v2777_v11  ;;  %v1444_v35 = vpop.f32.mrb[33].mxu1 }
 0x3ec   : > { %v1445_v37 = vadd.f32 %v2777_v11, %v1444_v35  ;;  %v2018_v19 = vpop.f32.mrb[34].mxu1 }
 0x3ed   : > { %v1537_v38 = vmax.f32 %v1453_v44, 0.0  ;;  %v1456_v40 = vadd.f32 %v2018_v19, %v2777_v11  ;;  %v1447_v13 = vpop.f32.mrb[35].mxu1 }
 0x3ee   : > { %v1535_v47 = vmax.f32 %v1445_v37, 0.0  ;;  %v1448_v6 = vadd.f32 %v2777_v11, %v1447_v13 }
 0x3ef   : > { %1569 = vst [vmem:[%s2785_s8 + $0x70] sm:$0xff] %v1537_v38  ;;  %v1538_v21 = vmax.f32 %v1456_v40, 0.0 }
 0x3f0   : > { %1567 = vst [vmem:[%s2785_s8 + $0x60] sm:$0xff] %v1535_v47  ;;  %v1536_v33 = vmax.f32 %v1448_v6, 0.0 }
 0x3f1   : > { %1570 = vst [vmem:[%s2785_s8 + $0x78] sm:$0xff] %v1538_v21 }
 0x3f2   : > { %1568 = vst [vmem:[%s2785_s8 + $0x68] sm:$0xff] %v1536_v33 }
 0x401   : > { %v2021_v52 = vpop.f32.mrb[36].mxu1 }
 0x402   : > { %v1469_v42 = vadd.f32 %v2021_v52, %v2777_v11  ;;  %v1460_v30 = vpop.f32.mrb[37].mxu1 }
 0x403   : > { %v1461_v34 = vadd.f32 %v2777_v11, %v1460_v30  ;;  %v2022_v53 = vpop.f32.mrb[38].mxu1 }
 0x404   : > { %v1541_v27 = vmax.f32 %v1469_v42, 0.0  ;;  %v1472_v46 = vadd.f32 %v2022_v53, %v2777_v11  ;;  %v1463_v50 = vpop.f32.mrb[39].mxu1 }
 0x405   : > { %v1539_v43 = vmax.f32 %v1461_v34, 0.0  ;;  %v1464_v54 = vadd.f32 %v2777_v11, %v1463_v50 }
 0x406   : > { %1573 = vst [vmem:[%s2785_s8 + $0x90] sm:$0xff] %v1541_v27  ;;  %v1542_v57 = vmax.f32 %v1472_v46, 0.0 }
 0x407   : > { %1571 = vst [vmem:[%s2785_s8 + $0x80] sm:$0xff] %v1539_v43  ;;  %v1540_v36 = vmax.f32 %v1464_v54, 0.0 }
 0x408   : > { %1574 = vst [vmem:[%s2785_s8 + $0x98] sm:$0xff] %v1542_v57 }
 0x409   : > { %1572 = vst [vmem:[%s2785_s8 + $0x88] sm:$0xff] %v1540_v36  ;;  %v2025_v1 = vpop.f32.mrb[40].mxu1 }
 0x40a   : > { %v1485_v48 = vadd.f32 %v2025_v1, %v2777_v11  ;;  %v1476_v9 = vpop.f32.mrb[41].mxu1 }
 0x40b   : > { %v1477_v14 = vadd.f32 %v2777_v11, %v1476_v9  ;;  %v2026_v60 = vpop.f32.mrb[42].mxu1 }
 0x40c   : > { %v1545_v17 = vmax.f32 %v1485_v48, 0.0  ;;  %v1488_v62 = vadd.f32 %v2026_v60, %v2777_v11  ;;  %v1479_v51 = vpop.f32.mrb[43].mxu1 }
 0x40d   : > { %v1543_v15 = vmax.f32 %v1477_v14, 0.0  ;;  %v1480_v31 = vadd.f32 %v2777_v11, %v1479_v51 }
 0x40e   : > { %1577 = vst [vmem:[%s2785_s8 + $0xb0] sm:$0xff] %v1545_v17  ;;  %v1546_v0 = vmax.f32 %v1488_v62, 0.0 }
 0x40f   : > { %1575 = vst [vmem:[%s2785_s8 + $0xa0] sm:$0xff] %v1543_v15  ;;  %v1544_v56 = vmax.f32 %v1480_v31, 0.0 }
 0x410   : > { %1578 = vst [vmem:[%s2785_s8 + $0xb8] sm:$0xff] %v1546_v0 }
 0x411   : > { %1576 = vst [vmem:[%s2785_s8 + $0xa8] sm:$0xff] %v1544_v56  ;;  %v2029_v59 = vpop.f32.mrb[44].mxu1 }
 0x412   : > { %v1501_v2 = vadd.f32 %v2029_v59, %v2777_v11  ;;  %v1492_v10 = vpop.f32.mrb[45].mxu1 }
 0x413   : > { %v1493_v4 = vadd.f32 %v2777_v11, %v1492_v10  ;;  %v2030_v12 = vpop.f32.mrb[46].mxu1 }
 0x414   : > { %v1549_v61 = vmax.f32 %v1501_v2, 0.0  ;;  %v1504_v23 = vadd.f32 %v2030_v12, %v2777_v11  ;;  %v1495_v24 = vpop.f32.mrb[47].mxu1 }
 0x415   : > { %v1547_v45 = vmax.f32 %v1493_v4, 0.0  ;;  %v1496_v63 = vadd.f32 %v2777_v11, %v1495_v24 }
 0x416   : > { %1581 = vst [vmem:[%s2785_s8 + $0xd0] sm:$0xff] %v1549_v61  ;;  %v1550_v39 = vmax.f32 %v1504_v23, 0.0 }
 0x417   : > { %1579 = vst [vmem:[%s2785_s8 + $0xc0] sm:$0xff] %v1547_v45  ;;  %v1548_v3 = vmax.f32 %v1496_v63, 0.0 }
 0x418   : > { %1582 = vst [vmem:[%s2785_s8 + $0xd8] sm:$0xff] %v1550_v39 }
 0x419   : > { %1580 = vst [vmem:[%s2785_s8 + $0xc8] sm:$0xff] %v1548_v3  ;;  %v2033_v58 = vpop.f32.mrb[48].mxu1 }
 0x41a   : > { %v1517_v5 = vadd.f32 %v2033_v58, %v2777_v11  ;;  %v1508_v55 = vpop.f32.mrb[49].mxu1 }
 0x41b   : > { %v1509_v20 = vadd.f32 %v2777_v11, %v1508_v55  ;;  %v2034_v7 = vpop.f32.mrb[50].mxu1 }
 0x41c   : > { %v1553_v8 = vmax.f32 %v1517_v5, 0.0  ;;  %v1520_v49 = vadd.f32 %v2034_v7, %v2777_v11  ;;  %v1511_v25 = vpop.f32.mrb[51].mxu1 }
 0x41d   : > { %v1551_v18 = vmax.f32 %v1509_v20, 0.0  ;;  %v1512_v26 = vadd.f32 %v2777_v11, %v1511_v25 }
 0x41e   : > { %1585 = vst [vmem:[%s2785_s8 + $0xf0] sm:$0xff] %v1553_v8  ;;  %v1554_v16 = vmax.f32 %v1520_v49, 0.0 }
 0x41f   : > { %1583 = vst [vmem:[%s2785_s8 + $0xe0] sm:$0xff] %v1551_v18  ;;  %v1552_v22 = vmax.f32 %v1512_v26, 0.0 }
 0x420   : > { %1586 = vst [vmem:[%s2785_s8 + $0xf8] sm:$0xff] %v1554_v16 }
 0x421   : > { %1584 = vst [vmem:[%s2785_s8 + $0xe8] sm:$0xff] %v1552_v22 }
 0x422   : > { %2181 = shalt.err (!%p2178_p3)
}
 0x423   : > { %s2182_s23 = scalar_lea.hbm %s2849_s13, 4096  ;;  %s2186_s30 = scalar_lea.hbm %s2904_s5, 16384 }
 0x424   : > { %p2183_p4 = scmp.ne.s32.totalorder %s2849_s13, %s2182_s23  ;;  %p2187_p9 = scmp.lt.u32.totalorder %s2849_s13, %s2904_s5 }
 0x425   : > { %p2188_p10 = scmp.lt.u32.totalorder %s2186_s30, %s2182_s23  ;;  %p2190_p12 = scmp.lt.u32.totalorder %s2182_s23, %s2849_s13 }
 0x426   : > { %p2184_p7 = pnand %p2183_p4, %p2303_p5 }
 0x427   : > { %p2189_p11 = por %p2188_p10, %p2187_p9 }
 0x428   : > { %p2185_p8 = pneg %p2184_p7 }
 0x429   : > { %p2191_p13 = por %p2190_p12, %p2189_p11 }
 0x42b   : > { %p2192_p0 = pnand %p2191_p13, %p2185_p8 }
 0x42d   : > { %2195 = shalt.err (!%p2192_p0)
}
 0x42e   : > { %s2233_s8 = smov 128   ;;  %s2234_s9 = smov 8  }
 0x42f   : > { %2051 = dma.vmem_to_hbm [thread:$0]  (%p2303_p5), %s2851_s10, 4096, %s2849_s13, %s2858_s22, %s2233_s8, %s2233_s8, %s2234_s9  }
 0x430 PF: > { %p2057_p1 = scmp.ge.s32.totalorder %s2230_s21, 2  ;;  %s1617_s11 = sand.u32 1, %s2218_s18  }
 0x431   : > { %s1618_s12 = scalar_lea.sflag [#allocation3], %s1617_s11 }
 0x432   : > { %p2054_p2 = pnand %p2057_p1, %p2307_p6 }
 0x434   : > { %2213 = dma.done.wait (!%p2054_p2), %s1618_s12, 4096  }
 0x435   : > { %2215 = vsyncadd (!%p2054_p2), %s1618_s12, 4294963200  ;;  %p15_p3 = scmp.ge.s32.totalorder %s2290_s24, 6   ;;  %s2907_s18 = smov %s2222_s19 }
 0x436   : > { %s2908_s19 = smov %s2226_s20  ;;  %s2909_s20 = smov %s2301_s27 }
 0x437   : > { %s2910_s21 = smov %s2290_s24  ;;  %17 = sbr.rel (!%p15_p3) target bundleno = 3 (0x3), region = 75 }
 0x43e   :  { %1623 = vsyncpa [#allocation3], 1 }
 0x43f   :  { %1625 = vsyncpa [#allocation3 + $0x1], 1 }

</bundles_post_ra>
